<compile_context>
chip_gen: v5e
topology: v5e:2x2
jax: 0.10.0
libtpu: 0.0.40
codegen_flags: <defaults>
</compile_context>

<pallas_src>
import jax
import jax.numpy as jnp
from jax import lax
from jax.experimental import pallas as pl
from jax.experimental.pallas import tpu as pltpu

EPS = 1e-5  # nn.BatchNorm2d default eps


def _round_up(x, m):
    return (x + m - 1) // m * m


# ---------------- Pallas kernel ----------------

def _make_block_kernel(Wp, R2, HWq, CP, TQ):
    def kernel(xin_ref, w1_ref, b1_ref, lo_ref, gate_ref, w2_ref, b2_ref,
               o_ref, h1_ref):
        # ---- conv1 (+BN1 bias, ReLU, zero-pad gating), fused per row chunk.
        # The wrapper packed the 3x5 tap window into lanes, so each chunk is a
        # single aligned GEMM; the epilogue writes h1 (which already contains
        # the 3 dj-shifted copies of conv1's output plus the raw residual).
        for s in range(0, R2, TQ):
            n = min(TQ, R2 - s)
            acc = jnp.dot(xin_ref[s:s + n, :], w1_ref[...],
                          preferred_element_type=jnp.float32)
            # lo = 0 on conv lanes (ReLU), -1e30 on residual lanes (pass-through);
            # gate zeroes conv lanes whose shifted position is zero padding.
            h1 = (jnp.maximum(acc + b1_ref[...], lo_ref[...])
                  * gate_ref[s:s + n, :].astype(jnp.float32))
            h1_ref[s:s + n, :] = h1

        # ---- conv2 (+BN2 bias, residual add via pass-through lanes, ReLU).
        # The 3 di taps are 8-aligned row views of the h1 scratch (the dj taps
        # live in lanes); taps accumulate as values, epilogue fused per chunk.
        for s in range(0, HWq, TQ):
            n = min(TQ, HWq - s)
            acc = jnp.dot(h1_ref[s:s + n, :].astype(jnp.bfloat16),
                          w2_ref[0:CP, :], preferred_element_type=jnp.float32)
            acc = acc + jnp.dot(
                h1_ref[s + Wp:s + Wp + n, :].astype(jnp.bfloat16),
                w2_ref[CP:2 * CP, :], preferred_element_type=jnp.float32)
            acc = acc + jnp.dot(
                h1_ref[s + 2 * Wp:s + 2 * Wp + n, :].astype(jnp.bfloat16),
                w2_ref[2 * CP:3 * CP, :], preferred_element_type=jnp.float32)
            o_ref[s:s + n, :] = jnp.maximum(acc + b2_ref[...], 0.0
                                            ).astype(o_ref.dtype)

    return kernel


# ---------------- parameters ----------------

def init_params(key, ext_c, x_c, planes):
    inplanes = ext_c + x_c
    ks = jax.random.split(key, 10)
    return {
        # conv weights in PyTorch layout (out, in, kh, kw), bias=False
        "w1": 0.1 * jax.random.normal(ks[0], (planes, inplanes, 3, 3), jnp.float32),
        "w2": 0.1 * jax.random.normal(ks[1], (planes, planes, 3, 3), jnp.float32),
        # BatchNorm2d(planes) params + running stats
        "g1": 1.0 + 0.1 * jax.random.normal(ks[2], (planes,), jnp.float32),
        "b1": 0.1 * jax.random.normal(ks[3], (planes,), jnp.float32),
        "m1": 0.05 * jax.random.normal(ks[4], (planes,), jnp.float32),
        "v1": 1.0 + 0.1 * jax.random.uniform(ks[5], (planes,), jnp.float32),
        "g2": 1.0 + 0.1 * jax.random.normal(ks[6], (planes,), jnp.float32),
        "b2": 0.1 * jax.random.normal(ks[7], (planes,), jnp.float32),
        "m2": 0.05 * jax.random.normal(ks[8], (planes,), jnp.float32),
        "v2": 1.0 + 0.1 * jax.random.uniform(ks[9], (planes,), jnp.float32),
    }


# ---------------- forward (Pallas) ----------------

def basic_block_forward(ext_x, x, p):
    """BasicBlock.forward([ext_x, x]), stride=1, downsample=None. NCHW in/out."""
    N, ext_c, H, W = ext_x.shape
    x_c = x.shape[1]
    Cin = ext_c + x_c
    P = p["w1"].shape[0]
    assert x_c == P, "identity add requires planes == channels of x"

    Wp = _round_up(W + 2, 8)     # row pitch of the flattened-spatial layout
    R2 = (H + 2) * Wp            # h1 rows (incl. zero-pad halo), multiple of 8
    HWq = H * Wp                 # conv2 / output rows per image
    KT = 15 * Cin                # 3(kh) x 5(kw window) taps packed into lanes
    CK = 128                     # lane width of the im2col input
    CP = 128                     # lane width of h1 / output
    NG = 3 * P                   # conv lane-groups (dj = 0,1,2) in h1
    TQ = 128                     # row-chunk size inside the kernel
    # TODO(synk): tile the contraction / lane groups when 15*Cin > 128 or 3*P + x_c > 128.
    assert KT <= CK and NG + x_c <= CP and P <= CP

    f32, bf16 = jnp.float32, jnp.bfloat16

    # NCHW -> NHWC, channel concat (torch.cat((ext_x, x), dim=1))
    cx = jnp.concatenate([jnp.transpose(ext_x, (0, 2, 3, 1)),
                          jnp.transpose(x, (0, 2, 3, 1))], axis=-1)  # (N,H,W,Cin)

    # ---- wide im2col into lanes: flat row r = h_pad*Wp + w_pad carries
    # cx[h_pad+di-2, w_pad+e-2, :] at lane group (di, e).  Lane groups
    # e in [j, j+2] reconstruct the 3x3 stencil of the dj=j shifted output.
    cxp = jnp.pad(cx, ((0, 0), (2, 3), (2, Wp + 3 - W), (0, 0)))
    cols = []
    for di in range(3):
        for e in range(5):
            cols.append(cxp[:, di:di + H + 2, e:e + Wp, :])
    xin = jnp.concatenate(cols, axis=-1)                        # (N,H+2,Wp,15*Cin)
    xin = jnp.pad(xin, ((0, 0), (0, 0), (0, 0), (0, CK - KT)))
    xin = xin.astype(bf16).reshape(N * R2, CK)

    # ---- fold BN (eval mode) scale into conv weights; keep biases separate.
    # TODO(synk): train-mode batch statistics / running-stat updates not implemented.
    s1 = p["g1"] / jnp.sqrt(p["v1"] + EPS)
    b1 = p["b1"] - p["m1"] * s1
    s2 = p["g2"] / jnp.sqrt(p["v2"] + EPS)
    b2 = p["b2"] - p["m2"] * s2

    # conv1 weight: rows = (di, e, cin) taps, cols = (dj group j, planes) plus
    # residual pass-through columns that copy the raw x channels into h1.
    w1s = jnp.transpose(p["w1"], (2, 3, 1, 0)) * s1             # (kh,kw,Cin,P)
    W1 = jnp.zeros((CK, CP), f32)
    for di in range(3):
        for e in range(5):
            for j in range(3):
                dj = e - j
                if 0 <= dj <= 2:
                    W1 = W1.at[(di * 5 + e) * Cin:(di * 5 + e + 1) * Cin,
                               j * P:(j + 1) * P].set(w1s[di, dj])
    idrow = (1 * 5 + 2) * Cin + ext_c          # center tap of the dj=1 window
    W1 = W1.at[idrow:idrow + x_c, NG:NG + x_c].set(jnp.eye(x_c, dtype=f32))
    w1_big = W1.astype(bf16)

    b1_big = jnp.zeros((1, CP), f32).at[0, 0:NG].set(jnp.tile(b1, 3))
    lo_big = jnp.zeros((1, CP), f32).at[0, NG:NG + x_c].set(-1e30)

    # validity gate: zero conv lanes whose (dj-shifted) position is padding;
    # residual lanes stay 1 (the wrapper already zero-padded their data).
    hh = jnp.arange(H + 2)
    ww = jnp.arange(Wp)
    row_ok = (hh >= 1) & (hh <= H)
    g_cols = []
    for j in range(3):
        col_ok = (ww + j >= 1) & (ww + j <= W)
        g = (row_ok[:, None] & col_ok[None, :]).astype(f32).reshape(R2, 1)
        g_cols.append(jnp.tile(g, (1, P)))
    gate = jnp.concatenate(g_cols + [jnp.ones((R2, x_c), f32)], axis=1)
    gate = jnp.pad(gate, ((0, 0), (0, CP - NG - x_c))).astype(bf16)

    # conv2 weight: one (CP, CP) matrix per di tap; rows = (dj group j, planes)
    # plus identity rows (residual lanes -> output channels) on the di=1 tap.
    w2s = jnp.transpose(p["w2"], (2, 3, 1, 0)) * s2             # (kh,kw,P,P)
    W2 = jnp.zeros((3, CP, CP), f32)
    for di in range(3):
        for j in range(3):
            W2 = W2.at[di, j * P:(j + 1) * P, 0:P].set(w2s[di, j])
    W2 = W2.at[1, NG:NG + x_c, 0:x_c].set(jnp.eye(x_c, dtype=f32))
    w2_big = W2.reshape(3 * CP, CP).astype(bf16)

    b2_big = jnp.zeros((1, CP), f32).at[0, 0:P].set(b2)

    kernel = _make_block_kernel(Wp, R2, HWq, CP, TQ)

    flops = 2 * N * (R2 * CK * CP + 3 * HWq * CP * CP)
    bytes_accessed = (xin.size * 2 + w1_big.size * 2 + w2_big.size * 2
                      + gate.size * 2
                      + (b1_big.size + lo_big.size + b2_big.size) * 4
                      + N * HWq * CP * 2)

    out_flat = pl.pallas_call(
        kernel,
        out_shape=jax.ShapeDtypeStruct((N * HWq, CP), bf16),
        grid=(N,),
        in_specs=[
            pl.BlockSpec((R2, CK), lambda i: (i, 0)),          # im2col activations (bf16)
            pl.BlockSpec((CK, CP), lambda i: (0, 0)),          # folded conv1 weight
            pl.BlockSpec((1, CP), lambda i: (0, 0)),           # bn1 bias
            pl.BlockSpec((1, CP), lambda i: (0, 0)),           # relu / pass-through clamp
            pl.BlockSpec((R2, CP), lambda i: (0, 0)),          # validity gate (bf16)
            pl.BlockSpec((3 * CP, CP), lambda i: (0, 0)),      # folded conv2 weight (+identity)
            pl.BlockSpec((1, CP), lambda i: (0, 0)),           # bn2 bias
        ],
        out_specs=pl.BlockSpec((HWq, CP), lambda i: (i, 0)),
        scratch_shapes=[
            pltpu.VMEM((R2, CP), jnp.float32),                 # h1 (conv1 out / conv2 in)
        ],
        compiler_params=pltpu.CompilerParams(
            dimension_semantics=("parallel",),
            vmem_limit_bytes=32 * 1024 * 1024,                 # usage ~1.5 MiB/step
        ),
        cost_estimate=pl.CostEstimate(flops=flops, transcendentals=0,
                                      bytes_accessed=bytes_accessed),
    )(xin, w1_big, b1_big, lo_big, gate, w2_big, b2_big)

    # TODO(synk): when chaining BasicBlocks, keep this flat lane-padded layout
    # between calls instead of repacking to NCHW each time.
    out = out_flat.reshape(N, H, Wp, CP)[:, :, :W, :P]
    return jnp.transpose(out, (0, 3, 1, 2)).astype(jnp.float32)   # back to NCHW


# ---------------- pure-JAX reference (bf16-matched) ----------------

def ref_forward(ext_x, x, p):
    ext_nhwc = jnp.transpose(ext_x, (0, 2, 3, 1))
    x_nhwc = jnp.transpose(x, (0, 2, 3, 1))
    cx = jnp.concatenate([ext_nhwc, x_nhwc], axis=-1)
    s1 = p["g1"] / jnp.sqrt(p["v1"] + EPS)
    b1 = p["b1"] - p["m1"] * s1
    s2 = p["g2"] / jnp.sqrt(p["v2"] + EPS)
    b2 = p["b2"] - p["m2"] * s2
    w1 = (jnp.transpose(p["w1"], (2, 3, 1, 0)) * s1).astype(jnp.bfloat16)
    w2 = (jnp.transpose(p["w2"], (2, 3, 1, 0)) * s2).astype(jnp.bfloat16)
    dn = ("NHWC", "HWIO", "NHWC")
    h = lax.conv_general_dilated(cx.astype(jnp.bfloat16), w1, (1, 1), "SAME",
                                 dimension_numbers=dn,
                                 preferred_element_type=jnp.float32)
    h = jnp.maximum(h + b1, 0.0)
    h = lax.conv_general_dilated(h.astype(jnp.bfloat16), w2, (1, 1), "SAME",
                                 dimension_numbers=dn,
                                 preferred_element_type=jnp.float32)
    identity = x_nhwc.astype(jnp.bfloat16).astype(jnp.float32)  # kernel's bf16 residual path
    out = jnp.maximum(h + b2 + identity, 0.0)
    return jnp.transpose(out, (0, 3, 1, 2))


if __name__ == "__main__":
    key = jax.random.PRNGKey(0)
    k_ext, k_x, k_p = jax.random.split(key, 3)

    # ext_x and x each (N, 4, 16, 16): inplanes = 8, planes = 4
    N, ext_c, x_c, H, W = 2, 4, 4, 16, 16
    planes = x_c

    ext_x = jax.random.normal(k_ext, (N, ext_c, H, W), jnp.float32)
    x = jax.random.normal(k_x, (N, x_c, H, W), jnp.float32)
    params = init_params(k_p, ext_c, x_c, planes)

    fwd = jax.jit(basic_block_forward)
    out = jax.block_until_ready(fwd(ext_x, x, params))

    ref = ref_forward(ext_x, x, params)
    err = float(jnp.max(jnp.abs(out - ref)))
    if err > 3e-2:   # bf16 matmuls + bf16 output/residual vs f32 reference
        raise AssertionError(f"Pallas output mismatch vs reference, max abs err = {err}")

    print("KERNEL_OK")
</pallas_src>

<mosaic_0001>
module attributes {stable_mosaic.version = 11 : i64} {
  func.func @kernel(%arg0: i32, %arg1: memref<432x128xbf16, #tpu.memory_space<vmem>>, %arg2: memref<128x128xbf16, #tpu.memory_space<vmem>>, %arg3: memref<1x128xf32, #tpu.memory_space<vmem>>, %arg4: memref<1x128xf32, #tpu.memory_space<vmem>>, %arg5: memref<432x128xbf16, #tpu.memory_space<vmem>>, %arg6: memref<384x128xbf16, #tpu.memory_space<vmem>>, %arg7: memref<1x128xf32, #tpu.memory_space<vmem>>, %arg8: memref<384x128xbf16, #tpu.memory_space<vmem>>, %arg9: memref<432x128xf32, #tpu.memory_space<vmem>>) attributes {dimension_semantics = [#tpu.dimension_semantics<parallel>], iteration_bounds = array<i64: 2>, scalar_prefetch = 0 : i64, scratch_operands = 1 : i64, tpu.core_type = #tpu.core_type<tc>, window_params = [{transform_indices = @transform_0, window_bounds = array<i64: 432, 128>}, {pipeline_mode = #tpu.pipeline_mode<synchronous>, transform_indices = @transform_1, window_bounds = array<i64: 128, 128>}, {pipeline_mode = #tpu.pipeline_mode<synchronous>, transform_indices = @transform_2, window_bounds = array<i64: 1, 128>}, {pipeline_mode = #tpu.pipeline_mode<synchronous>, transform_indices = @transform_3, window_bounds = array<i64: 1, 128>}, {pipeline_mode = #tpu.pipeline_mode<synchronous>, transform_indices = @transform_4, window_bounds = array<i64: 432, 128>}, {pipeline_mode = #tpu.pipeline_mode<synchronous>, transform_indices = @transform_5, window_bounds = array<i64: 384, 128>}, {pipeline_mode = #tpu.pipeline_mode<synchronous>, transform_indices = @transform_6, window_bounds = array<i64: 1, 128>}, {transform_indices = @transform_7, window_bounds = array<i64: 384, 128>}]} {
    %c0 = arith.constant 0 : index
    %c0_0 = arith.constant 0 : index
    %0 = vector.load %arg1[%c0, %c0_0] : memref<432x128xbf16, #tpu.memory_space<vmem>>, vector<128x128xbf16>
    %c0_1 = arith.constant 0 : index
    %c0_2 = arith.constant 0 : index
    %1 = vector.load %arg2[%c0_1, %c0_2] : memref<128x128xbf16, #tpu.memory_space<vmem>>, vector<128x128xbf16>
    %cst = arith.constant dense<0.000000e+00> : vector<128x128xf32>
    %2 = tpu.matmul %0, %1, %cst {dimension_numbers = #tpu.dot_dimension_numbers<[1], [0], [0], [1], [0, 0, 1, 1], [], []>} : vector<128x128xbf16>, vector<128x128xbf16>, vector<128x128xf32> -> vector<128x128xf32>
    %c0_3 = arith.constant 0 : index
    %c0_4 = arith.constant 0 : index
    %3 = vector.load %arg3[%c0_3, %c0_4] : memref<1x128xf32, #tpu.memory_space<vmem>>, vector<1x128xf32>
    %4 = vector.broadcast %3 : vector<1x128xf32> to vector<128x128xf32>
    %5 = arith.addf %2, %4 : vector<128x128xf32>
    %c0_5 = arith.constant 0 : index
    %c0_6 = arith.constant 0 : index
    %6 = vector.load %arg4[%c0_5, %c0_6] : memref<1x128xf32, #tpu.memory_space<vmem>>, vector<1x128xf32>
    %7 = vector.broadcast %6 : vector<1x128xf32> to vector<128x128xf32>
    %8 = arith.maximumf %5, %7 : vector<128x128xf32>
    %c0_7 = arith.constant 0 : index
    %c0_8 = arith.constant 0 : index
    %9 = vector.load %arg5[%c0_7, %c0_8] : memref<432x128xbf16, #tpu.memory_space<vmem>>, vector<128x128xbf16>
    %10 = arith.extf %9 : vector<128x128xbf16> to vector<128x128xf32>
    %11 = arith.mulf %8, %10 : vector<128x128xf32>
    %c0_9 = arith.constant 0 : index
    %c0_10 = arith.constant 0 : index
    %12 = vector.load %arg9[%c0_9, %c0_10] : memref<432x128xf32, #tpu.memory_space<vmem>>, vector<128x128xf32>
    tpu.vector_store %arg9[%c0_9, %c0_10], %11 {strides = array<i32>} : memref<432x128xf32, #tpu.memory_space<vmem>>, vector<128x128xf32>,
    %c128 = arith.constant 128 : index
    %c0_11 = arith.constant 0 : index
    %13 = vector.load %arg1[%c128, %c0_11] : memref<432x128xbf16, #tpu.memory_space<vmem>>, vector<128x128xbf16>
    %c0_12 = arith.constant 0 : index
    %c0_13 = arith.constant 0 : index
    %14 = vector.load %arg2[%c0_12, %c0_13] : memref<128x128xbf16, #tpu.memory_space<vmem>>, vector<128x128xbf16>
    %cst_14 = arith.constant dense<0.000000e+00> : vector<128x128xf32>
    %15 = tpu.matmul %13, %14, %cst_14 {dimension_numbers = #tpu.dot_dimension_numbers<[1], [0], [0], [1], [0, 0, 1, 1], [], []>} : vector<128x128xbf16>, vector<128x128xbf16>, vector<128x128xf32> -> vector<128x128xf32>
    %c0_15 = arith.constant 0 : index
    %c0_16 = arith.constant 0 : index
    %16 = vector.load %arg3[%c0_15, %c0_16] : memref<1x128xf32, #tpu.memory_space<vmem>>, vector<1x128xf32>
    %17 = vector.broadcast %16 : vector<1x128xf32> to vector<128x128xf32>
    %18 = arith.addf %15, %17 : vector<128x128xf32>
    %c0_17 = arith.constant 0 : index
    %c0_18 = arith.constant 0 : index
    %19 = vector.load %arg4[%c0_17, %c0_18] : memref<1x128xf32, #tpu.memory_space<vmem>>, vector<1x128xf32>
    %20 = vector.broadcast %19 : vector<1x128xf32> to vector<128x128xf32>
    %21 = arith.maximumf %18, %20 : vector<128x128xf32>
    %c128_19 = arith.constant 128 : index
    %c0_20 = arith.constant 0 : index
    %22 = vector.load %arg5[%c128_19, %c0_20] : memref<432x128xbf16, #tpu.memory_space<vmem>>, vector<128x128xbf16>
    %23 = arith.extf %22 : vector<128x128xbf16> to vector<128x128xf32>
    %24 = arith.mulf %21, %23 : vector<128x128xf32>
    %c128_21 = arith.constant 128 : index
    %c0_22 = arith.constant 0 : index
    %25 = vector.load %arg9[%c128_21, %c0_22] : memref<432x128xf32, #tpu.memory_space<vmem>>, vector<128x128xf32>
    tpu.vector_store %arg9[%c128_21, %c0_22], %24 {strides = array<i32>} : memref<432x128xf32, #tpu.memory_space<vmem>>, vector<128x128xf32>,
    %c256 = arith.constant 256 : index
    %c0_23 = arith.constant 0 : index
    %26 = vector.load %arg1[%c256, %c0_23] : memref<432x128xbf16, #tpu.memory_space<vmem>>, vector<128x128xbf16>
    %c0_24 = arith.constant 0 : index
    %c0_25 = arith.constant 0 : index
    %27 = vector.load %arg2[%c0_24, %c0_25] : memref<128x128xbf16, #tpu.memory_space<vmem>>, vector<128x128xbf16>
    %cst_26 = arith.constant dense<0.000000e+00> : vector<128x128xf32>
    %28 = tpu.matmul %26, %27, %cst_26 {dimension_numbers = #tpu.dot_dimension_numbers<[1], [0], [0], [1], [0, 0, 1, 1], [], []>} : vector<128x128xbf16>, vector<128x128xbf16>, vector<128x128xf32> -> vector<128x128xf32>
    %c0_27 = arith.constant 0 : index
    %c0_28 = arith.constant 0 : index
    %29 = vector.load %arg3[%c0_27, %c0_28] : memref<1x128xf32, #tpu.memory_space<vmem>>, vector<1x128xf32>
    %30 = vector.broadcast %29 : vector<1x128xf32> to vector<128x128xf32>
    %31 = arith.addf %28, %30 : vector<128x128xf32>
    %c0_29 = arith.constant 0 : index
    %c0_30 = arith.constant 0 : index
    %32 = vector.load %arg4[%c0_29, %c0_30] : memref<1x128xf32, #tpu.memory_space<vmem>>, vector<1x128xf32>
    %33 = vector.broadcast %32 : vector<1x128xf32> to vector<128x128xf32>
    %34 = arith.maximumf %31, %33 : vector<128x128xf32>
    %c256_31 = arith.constant 256 : index
    %c0_32 = arith.constant 0 : index
    %35 = vector.load %arg5[%c256_31, %c0_32] : memref<432x128xbf16, #tpu.memory_space<vmem>>, vector<128x128xbf16>
    %36 = arith.extf %35 : vector<128x128xbf16> to vector<128x128xf32>
    %37 = arith.mulf %34, %36 : vector<128x128xf32>
    %c256_33 = arith.constant 256 : index
    %c0_34 = arith.constant 0 : index
    %38 = vector.load %arg9[%c256_33, %c0_34] : memref<432x128xf32, #tpu.memory_space<vmem>>, vector<128x128xf32>
    tpu.vector_store %arg9[%c256_33, %c0_34], %37 {strides = array<i32>} : memref<432x128xf32, #tpu.memory_space<vmem>>, vector<128x128xf32>,
    %c384 = arith.constant 384 : index
    %c0_35 = arith.constant 0 : index
    %39 = vector.load %arg1[%c384, %c0_35] : memref<432x128xbf16, #tpu.memory_space<vmem>>, vector<48x128xbf16>
    %c0_36 = arith.constant 0 : index
    %c0_37 = arith.constant 0 : index
    %40 = vector.load %arg2[%c0_36, %c0_37] : memref<128x128xbf16, #tpu.memory_space<vmem>>, vector<128x128xbf16>
    %cst_38 = arith.constant dense<0.000000e+00> : vector<48x128xf32>
    %41 = tpu.matmul %39, %40, %cst_38 {dimension_numbers = #tpu.dot_dimension_numbers<[1], [0], [0], [1], [0, 0, 1, 1], [], []>} : vector<48x128xbf16>, vector<128x128xbf16>, vector<48x128xf32> -> vector<48x128xf32>
    %c0_39 = arith.constant 0 : index
    %c0_40 = arith.constant 0 : index
    %42 = vector.load %arg3[%c0_39, %c0_40] : memref<1x128xf32, #tpu.memory_space<vmem>>, vector<1x128xf32>
    %43 = vector.broadcast %42 : vector<1x128xf32> to vector<48x128xf32>
    %44 = arith.addf %41, %43 : vector<48x128xf32>
    %c0_41 = arith.constant 0 : index
    %c0_42 = arith.constant 0 : index
    %45 = vector.load %arg4[%c0_41, %c0_42] : memref<1x128xf32, #tpu.memory_space<vmem>>, vector<1x128xf32>
    %46 = vector.broadcast %45 : vector<1x128xf32> to vector<48x128xf32>
    %47 = arith.maximumf %44, %46 : vector<48x128xf32>
    %c384_43 = arith.constant 384 : index
    %c0_44 = arith.constant 0 : index
    %48 = vector.load %arg5[%c384_43, %c0_44] : memref<432x128xbf16, #tpu.memory_space<vmem>>, vector<48x128xbf16>
    %49 = arith.extf %48 : vector<48x128xbf16> to vector<48x128xf32>
    %50 = arith.mulf %47, %49 : vector<48x128xf32>
    %c384_45 = arith.constant 384 : index
    %c0_46 = arith.constant 0 : index
    %51 = vector.load %arg9[%c384_45, %c0_46] : memref<432x128xf32, #tpu.memory_space<vmem>>, vector<48x128xf32>
    tpu.vector_store %arg9[%c384_45, %c0_46], %50 {strides = array<i32>} : memref<432x128xf32, #tpu.memory_space<vmem>>, vector<48x128xf32>,
    %c0_47 = arith.constant 0 : index
    %c0_48 = arith.constant 0 : index
    %52 = vector.load %arg9[%c0_47, %c0_48] : memref<432x128xf32, #tpu.memory_space<vmem>>, vector<128x128xf32>
    %53 = arith.truncf %52 : vector<128x128xf32> to vector<128x128xbf16>
    %c0_49 = arith.constant 0 : index
    %c0_50 = arith.constant 0 : index
    %54 = vector.load %arg6[%c0_49, %c0_50] : memref<384x128xbf16, #tpu.memory_space<vmem>>, vector<128x128xbf16>
    %cst_51 = arith.constant dense<0.000000e+00> : vector<128x128xf32>
    %55 = tpu.matmul %53, %54, %cst_51 {dimension_numbers = #tpu.dot_dimension_numbers<[1], [0], [0], [1], [0, 0, 1, 1], [], []>} : vector<128x128xbf16>, vector<128x128xbf16>, vector<128x128xf32> -> vector<128x128xf32>
    %c24 = arith.constant 24 : index
    %c0_52 = arith.constant 0 : index
    %56 = vector.load %arg9[%c24, %c0_52] : memref<432x128xf32, #tpu.memory_space<vmem>>, vector<128x128xf32>
    %57 = arith.truncf %56 : vector<128x128xf32> to vector<128x128xbf16>
    %c128_53 = arith.constant 128 : index
    %c0_54 = arith.constant 0 : index
    %58 = vector.load %arg6[%c128_53, %c0_54] : memref<384x128xbf16, #tpu.memory_space<vmem>>, vector<128x128xbf16>
    %cst_55 = arith.constant dense<0.000000e+00> : vector<128x128xf32>
    %59 = tpu.matmul %57, %58, %cst_55 {dimension_numbers = #tpu.dot_dimension_numbers<[1], [0], [0], [1], [0, 0, 1, 1], [], []>} : vector<128x128xbf16>, vector<128x128xbf16>, vector<128x128xf32> -> vector<128x128xf32>
    %60 = arith.addf %55, %59 : vector<128x128xf32>
    %c48 = arith.constant 48 : index
    %c0_56 = arith.constant 0 : index
    %61 = vector.load %arg9[%c48, %c0_56] : memref<432x128xf32, #tpu.memory_space<vmem>>, vector<128x128xf32>
    %62 = arith.truncf %61 : vector<128x128xf32> to vector<128x128xbf16>
    %c256_57 = arith.constant 256 : index
    %c0_58 = arith.constant 0 : index
    %63 = vector.load %arg6[%c256_57, %c0_58] : memref<384x128xbf16, #tpu.memory_space<vmem>>, vector<128x128xbf16>
    %cst_59 = arith.constant dense<0.000000e+00> : vector<128x128xf32>
    %64 = tpu.matmul %62, %63, %cst_59 {dimension_numbers = #tpu.dot_dimension_numbers<[1], [0], [0], [1], [0, 0, 1, 1], [], []>} : vector<128x128xbf16>, vector<128x128xbf16>, vector<128x128xf32> -> vector<128x128xf32>
    %65 = arith.addf %60, %64 : vector<128x128xf32>
    %c0_60 = arith.constant 0 : index
    %c0_61 = arith.constant 0 : index
    %66 = vector.load %arg7[%c0_60, %c0_61] : memref<1x128xf32, #tpu.memory_space<vmem>>, vector<1x128xf32>
    %67 = vector.broadcast %66 : vector<1x128xf32> to vector<128x128xf32>
    %68 = arith.addf %65, %67 : vector<128x128xf32>
    %cst_62 = arith.constant 0.000000e+00 : f32
    %69 = vector.broadcast %cst_62 : f32 to vector<128x128xf32>
    %70 = arith.maximumf %68, %69 : vector<128x128xf32>
    %71 = arith.truncf %70 : vector<128x128xf32> to vector<128x128xbf16>
    %c0_63 = arith.constant 0 : index
    %c0_64 = arith.constant 0 : index
    %72 = vector.load %arg8[%c0_63, %c0_64] : memref<384x128xbf16, #tpu.memory_space<vmem>>, vector<128x128xbf16>
    tpu.vector_store %arg8[%c0_63, %c0_64], %71 {strides = array<i32>} : memref<384x128xbf16, #tpu.memory_space<vmem>>, vector<128x128xbf16>,
    %c128_65 = arith.constant 128 : index
    %c0_66 = arith.constant 0 : index
    %73 = vector.load %arg9[%c128_65, %c0_66] : memref<432x128xf32, #tpu.memory_space<vmem>>, vector<128x128xf32>
    %74 = arith.truncf %73 : vector<128x128xf32> to vector<128x128xbf16>
    %c0_67 = arith.constant 0 : index
    %c0_68 = arith.constant 0 : index
    %75 = vector.load %arg6[%c0_67, %c0_68] : memref<384x128xbf16, #tpu.memory_space<vmem>>, vector<128x128xbf16>
    %cst_69 = arith.constant dense<0.000000e+00> : vector<128x128xf32>
    %76 = tpu.matmul %74, %75, %cst_69 {dimension_numbers = #tpu.dot_dimension_numbers<[1], [0], [0], [1], [0, 0, 1, 1], [], []>} : vector<128x128xbf16>, vector<128x128xbf16>, vector<128x128xf32> -> vector<128x128xf32>
    %c152 = arith.constant 152 : index
    %c0_70 = arith.constant 0 : index
    %77 = vector.load %arg9[%c152, %c0_70] : memref<432x128xf32, #tpu.memory_space<vmem>>, vector<128x128xf32>
    %78 = arith.truncf %77 : vector<128x128xf32> to vector<128x128xbf16>
    %c128_71 = arith.constant 128 : index
    %c0_72 = arith.constant 0 : index
    %79 = vector.load %arg6[%c128_71, %c0_72] : memref<384x128xbf16, #tpu.memory_space<vmem>>, vector<128x128xbf16>
    %cst_73 = arith.constant dense<0.000000e+00> : vector<128x128xf32>
    %80 = tpu.matmul %78, %79, %cst_73 {dimension_numbers = #tpu.dot_dimension_numbers<[1], [0], [0], [1], [0, 0, 1, 1], [], []>} : vector<128x128xbf16>, vector<128x128xbf16>, vector<128x128xf32> -> vector<128x128xf32>
    %81 = arith.addf %76, %80 : vector<128x128xf32>
    %c176 = arith.constant 176 : index
    %c0_74 = arith.constant 0 : index
    %82 = vector.load %arg9[%c176, %c0_74] : memref<432x128xf32, #tpu.memory_space<vmem>>, vector<128x128xf32>
    %83 = arith.truncf %82 : vector<128x128xf32> to vector<128x128xbf16>
    %c256_75 = arith.constant 256 : index
    %c0_76 = arith.constant 0 : index
    %84 = vector.load %arg6[%c256_75, %c0_76] : memref<384x128xbf16, #tpu.memory_space<vmem>>, vector<128x128xbf16>
    %cst_77 = arith.constant dense<0.000000e+00> : vector<128x128xf32>
    %85 = tpu.matmul %83, %84, %cst_77 {dimension_numbers = #tpu.dot_dimension_numbers<[1], [0], [0], [1], [0, 0, 1, 1], [], []>} : vector<128x128xbf16>, vector<128x128xbf16>, vector<128x128xf32> -> vector<128x128xf32>
    %86 = arith.addf %81, %85 : vector<128x128xf32>
    %c0_78 = arith.constant 0 : index
    %c0_79 = arith.constant 0 : index
    %87 = vector.load %arg7[%c0_78, %c0_79] : memref<1x128xf32, #tpu.memory_space<vmem>>, vector<1x128xf32>
    %88 = vector.broadcast %87 : vector<1x128xf32> to vector<128x128xf32>
    %89 = arith.addf %86, %88 : vector<128x128xf32>
    %cst_80 = arith.constant 0.000000e+00 : f32
    %90 = vector.broadcast %cst_80 : f32 to vector<128x128xf32>
    %91 = arith.maximumf %89, %90 : vector<128x128xf32>
    %92 = arith.truncf %91 : vector<128x128xf32> to vector<128x128xbf16>
    %c128_81 = arith.constant 128 : index
    %c0_82 = arith.constant 0 : index
    %93 = vector.load %arg8[%c128_81, %c0_82] : memref<384x128xbf16, #tpu.memory_space<vmem>>, vector<128x128xbf16>
    tpu.vector_store %arg8[%c128_81, %c0_82], %92 {strides = array<i32>} : memref<384x128xbf16, #tpu.memory_space<vmem>>, vector<128x128xbf16>,
    %c256_83 = arith.constant 256 : index
    %c0_84 = arith.constant 0 : index
    %94 = vector.load %arg9[%c256_83, %c0_84] : memref<432x128xf32, #tpu.memory_space<vmem>>, vector<128x128xf32>
    %95 = arith.truncf %94 : vector<128x128xf32> to vector<128x128xbf16>
    %c0_85 = arith.constant 0 : index
    %c0_86 = arith.constant 0 : index
    %96 = vector.load %arg6[%c0_85, %c0_86] : memref<384x128xbf16, #tpu.memory_space<vmem>>, vector<128x128xbf16>
    %cst_87 = arith.constant dense<0.000000e+00> : vector<128x128xf32>
    %97 = tpu.matmul %95, %96, %cst_87 {dimension_numbers = #tpu.dot_dimension_numbers<[1], [0], [0], [1], [0, 0, 1, 1], [], []>} : vector<128x128xbf16>, vector<128x128xbf16>, vector<128x128xf32> -> vector<128x128xf32>
    %c280 = arith.constant 280 : index
    %c0_88 = arith.constant 0 : index
    %98 = vector.load %arg9[%c280, %c0_88] : memref<432x128xf32, #tpu.memory_space<vmem>>, vector<128x128xf32>
    %99 = arith.truncf %98 : vector<128x128xf32> to vector<128x128xbf16>
    %c128_89 = arith.constant 128 : index
    %c0_90 = arith.constant 0 : index
    %100 = vector.load %arg6[%c128_89, %c0_90] : memref<384x128xbf16, #tpu.memory_space<vmem>>, vector<128x128xbf16>
    %cst_91 = arith.constant dense<0.000000e+00> : vector<128x128xf32>
    %101 = tpu.matmul %99, %100, %cst_91 {dimension_numbers = #tpu.dot_dimension_numbers<[1], [0], [0], [1], [0, 0, 1, 1], [], []>} : vector<128x128xbf16>, vector<128x128xbf16>, vector<128x128xf32> -> vector<128x128xf32>
    %102 = arith.addf %97, %101 : vector<128x128xf32>
    %c304 = arith.constant 304 : index
    %c0_92 = arith.constant 0 : index
    %103 = vector.load %arg9[%c304, %c0_92] : memref<432x128xf32, #tpu.memory_space<vmem>>, vector<128x128xf32>
    %104 = arith.truncf %103 : vector<128x128xf32> to vector<128x128xbf16>
    %c256_93 = arith.constant 256 : index
    %c0_94 = arith.constant 0 : index
    %105 = vector.load %arg6[%c256_93, %c0_94] : memref<384x128xbf16, #tpu.memory_space<vmem>>, vector<128x128xbf16>
    %cst_95 = arith.constant dense<0.000000e+00> : vector<128x128xf32>
    %106 = tpu.matmul %104, %105, %cst_95 {dimension_numbers = #tpu.dot_dimension_numbers<[1], [0], [0], [1], [0, 0, 1, 1], [], []>} : vector<128x128xbf16>, vector<128x128xbf16>, vector<128x128xf32> -> vector<128x128xf32>
    %107 = arith.addf %102, %106 : vector<128x128xf32>
    %c0_96 = arith.constant 0 : index
    %c0_97 = arith.constant 0 : index
    %108 = vector.load %arg7[%c0_96, %c0_97] : memref<1x128xf32, #tpu.memory_space<vmem>>, vector<1x128xf32>
    %109 = vector.broadcast %108 : vector<1x128xf32> to vector<128x128xf32>
    %110 = arith.addf %107, %109 : vector<128x128xf32>
    %cst_98 = arith.constant 0.000000e+00 : f32
    %111 = vector.broadcast %cst_98 : f32 to vector<128x128xf32>
    %112 = arith.maximumf %110, %111 : vector<128x128xf32>
    %113 = arith.truncf %112 : vector<128x128xf32> to vector<128x128xbf16>
    %c256_99 = arith.constant 256 : index
    %c0_100 = arith.constant 0 : index
    %114 = vector.load %arg8[%c256_99, %c0_100] : memref<384x128xbf16, #tpu.memory_space<vmem>>, vector<128x128xbf16>
    tpu.vector_store %arg8[%c256_99, %c0_100], %113 {strides = array<i32>} : memref<384x128xbf16, #tpu.memory_space<vmem>>, vector<128x128xbf16>,
    return
  }
  func.func @transform_0(%arg0: i32) -> (i32, i32) {
    %c0_i32 = arith.constant 0 : i32
    %c0_i32_0 = arith.constant 0 : i32
    return %arg0, %c0_i32 : i32, i32
  }
  func.func @transform_1(%arg0: i32) -> (i32, i32) {
    %c0_i32 = arith.constant 0 : i32
    %c0_i32_0 = arith.constant 0 : i32
    %c0_i32_1 = arith.constant 0 : i32
    return %c0_i32, %c0_i32_0 : i32, i32
  }
  func.func @transform_2(%arg0: i32) -> (i32, i32) {
    %c0_i32 = arith.constant 0 : i32
    %c0_i32_0 = arith.constant 0 : i32
    %c0_i32_1 = arith.constant 0 : i32
    return %c0_i32, %c0_i32_0 : i32, i32
  }
  func.func @transform_3(%arg0: i32) -> (i32, i32) {
    %c0_i32 = arith.constant 0 : i32
    %c0_i32_0 = arith.constant 0 : i32
    %c0_i32_1 = arith.constant 0 : i32
    return %c0_i32, %c0_i32_0 : i32, i32
  }
  func.func @transform_4(%arg0: i32) -> (i32, i32) {
    %c0_i32 = arith.constant 0 : i32
    %c0_i32_0 = arith.constant 0 : i32
    %c0_i32_1 = arith.constant 0 : i32
    return %c0_i32, %c0_i32_0 : i32, i32
  }
  func.func @transform_5(%arg0: i32) -> (i32, i32) {
    %c0_i32 = arith.constant 0 : i32
    %c0_i32_0 = arith.constant 0 : i32
    %c0_i32_1 = arith.constant 0 : i32
    return %c0_i32, %c0_i32_0 : i32, i32
  }
  func.func @transform_6(%arg0: i32) -> (i32, i32) {
    %c0_i32 = arith.constant 0 : i32
    %c0_i32_0 = arith.constant 0 : i32
    %c0_i32_1 = arith.constant 0 : i32
    return %c0_i32, %c0_i32_0 : i32, i32
  }
  func.func @transform_7(%arg0: i32) -> (i32, i32) {
    %c0_i32 = arith.constant 0 : i32
    %c0_i32_0 = arith.constant 0 : i32
    return %arg0, %c0_i32 : i32, i32
  }
}

</mosaic_0001>

<bundles_post_ra>
// kernel: basic_block_forward.1
= control target key start
LH: loop header
LB: loop body
LE: loop exit
PB: predicated region body
PF: predicated region fallthrough
CT: control target
= control target key end

     0   :  { %s3745_s24 = smov 0   ;;  %s4707_s0 = inlined_call_operand.vmem [shape: bf16[864,128], index: 0, kind: input, shape index: {}]   ;;  %s4708_s1 = inlined_call_operand.vmem [shape: bf16[128,128], index: 1, kind: input, shape index: {}]   ;;  %s4709_s2 = inlined_call_operand.vmem [shape: f32[1,128], index: 2, kind: input, shape index: {}]   ;;  %s4710_s3 = inlined_call_operand.vmem [shape: f32[1,128], index: 3, kind: input, shape index: {}]   ;;  %s4711_s4 = inlined_call_operand.vmem [shape: bf16[432,128], index: 4, kind: input, shape index: {}]   ;;  %s4712_s5 = inlined_call_operand.vmem [shape: bf16[384,128], index: 5, kind: input, shape index: {}]   ;;  %s4713_s6 = inlined_call_operand.vmem [shape: f32[1,128], index: 6, kind: input, shape index: {}]   ;;  %s4714_s7 = inlined_call_operand.vmem [shape: bf16[768,128], index: 7, kind: output, shape index: {}]  }
   0x1 LB: > { %s2729_s25 = sadd.s32 4294967295, %s3703_s24   ;;  %p2733_p0 = scmp.ge.s32.totalorder %s3703_s24, 1  ;;  %s3703_s24 = sphi %s3745_s24, %s17_s24  }
   0x2   : > { %p238_p1 = scmp.lt.s32.totalorder %s3703_s24, 3 }
   0x4   : > { %p239_p2 = pnand %p2733_p0, %p238_p1 }
   0x5   : > { %s270_s23 = smul.u32 (!%p239_p2), 54, %s2729_s25 }
   0x6   : > { %242 = sbr.rel (%p239_p2) target bundleno = 726 (0x2d6), region = 48 }
   0x7   : > { %p271_p3 = scmp.lt.s32.totalorder (!%p239_p2), %s270_s23, 107  ;;  %s276_s15 = smul.u32 (!%p239_p2), 48, %s2729_s25 }
   0x9   : > { %p277_p4 = scmp.lt.s32.totalorder (!%p239_p2), %s276_s15, 95 }
   0xb   : > { %v3277_v0 = vld [vmem:[%s4708_s1 + $0x38] sm:$0xff]  ;;  %v3276_v2 = vld [vmem:[%s4708_s1 + $0x30] sm:$0xff]  ;;  %v3275_v4 = vld [vmem:[%s4708_s1 + $0x28] sm:$0xff]  ;;  %s4716_s23 = smov (!%p271_p3, %s270_s23), 107  ;;  %s4718_s15 = smov (!%p277_p4, %s276_s15), 95 }
   0xc   : > { %v3293_v1 = vld [vmem:[%s4708_s1 + $0x38] sm:$0xff]  ;;  %414 = vmatpush.bf16.msra.mxu0 %v3277_v0  ;;  %v3292_v3 = vld [vmem:[%s4708_s1 + $0x30] sm:$0xff]  ;;  %v3291_v5 = vld [vmem:[%s4708_s1 + $0x28] sm:$0xff]  ;;  %s2734_s19 = sshll.u32 %s4716_s23, 2  ;;  %s2735_s20 = sshll.u32 %s4718_s15, 2 }
   0xd   : > { %679 = vmatpush.bf16.msra.mxu1 %v3293_v1  ;;  %v3309_v6 = vld [vmem:[%s4708_s1 + $0x38] sm:$0xff]  ;;  %v3308_v7 = vld [vmem:[%s4708_s1 + $0x30] sm:$0xff]  ;;  %v3274_v8 = vld [vmem:[%s4708_s1 + $0x20] sm:$0xff]  ;;  %s3821_s8 = scalar_lea.vmem %s4707_s0, %s2734_s19  ;;  %s4466_s26 = scalar_lea.vmem %s4714_s7, %s2735_s20 }
   0xe   : > { %944 = vmatpush.bf16.msra.mxu2 %v3309_v6  ;;  %v3290_v9 = vld [vmem:[%s4708_s1 + $0x20] sm:$0xff]  ;;  %v3273_v10 = vld [vmem:[%s4708_s1 + $0x18] sm:$0xff]  ;;  %v3307_v12 = vld [vmem:[%s4708_s1 + $0x28] sm:$0xff] }
   0xf   : > { %v3289_v11 = vld [vmem:[%s4708_s1 + $0x18] sm:$0xff]  ;;  %v3272_v13 = vld [vmem:[%s4708_s1 + $0x10] sm:$0xff]  ;;  %v3306_v15 = vld [vmem:[%s4708_s1 + $0x20] sm:$0xff] }
  0x10   : > { %415 = vmatpush.bf16.msra.mxu0 %v3276_v2  ;;  %v3288_v14 = vld [vmem:[%s4708_s1 + $0x10] sm:$0xff]  ;;  %v3271_v16 = vld [vmem:[%s4708_s1 + $0x8] sm:$0xff]  ;;  %v3305_v18 = vld [vmem:[%s4708_s1 + $0x18] sm:$0xff] }
  0x11   : > { %680 = vmatpush.bf16.msra.mxu1 %v3292_v3  ;;  %v3287_v17 = vld [vmem:[%s4708_s1 + $0x8] sm:$0xff]  ;;  %v3270_v19 = vld [vmem:[%s4708_s1] sm:$0xff]  ;;  %v3304_v21 = vld [vmem:[%s4708_s1 + $0x10] sm:$0xff] }
  0x12   : > { %945 = vmatpush.bf16.msra.mxu2 %v3308_v7  ;;  %v3286_v20 = vld [vmem:[%s4708_s1] sm:$0xff]  ;;  %v3303_v24 = vld [vmem:[%s4708_s1 + $0x8] sm:$0xff]  ;;  %v3264_v30 = vld [vmem:[%s3821_s8 + $0x10] sm:$0xff] }
  0x13   : > { %v3262_v22 = vld [vmem:[%s3821_s8] sm:$0xff]  ;;  %v3263_v27 = vld [vmem:[%s3821_s8 + $0x8] sm:$0xff]  ;;  %v3280_v31 = vld [vmem:[%s3821_s8 + $0x50] sm:$0xff] }
  0x14   : > { %416 = vmatpush.bf16.msra.mxu0 %v3275_v4  ;;  %v3278_v23 = vld [vmem:[%s3821_s8 + $0x40] sm:$0xff]  ;;  %v3279_v28 = vld [vmem:[%s3821_s8 + $0x48] sm:$0xff]  ;;  %v3296_v32 = vld [vmem:[%s3821_s8 + $0x90] sm:$0xff] }
  0x15   : > { %681 = vmatpush.bf16.msra.mxu1 %v3291_v5  ;;  %v3302_v25 = vld [vmem:[%s4708_s1] sm:$0xff]  ;;  %v3295_v29 = vld [vmem:[%s3821_s8 + $0x88] sm:$0xff]  ;;  %v3265_v33 = vld [vmem:[%s3821_s8 + $0x18] sm:$0xff] }
  0x16   : > { %946 = vmatpush.bf16.msra.mxu2 %v3307_v12  ;;  %v3294_v26 = vld [vmem:[%s3821_s8 + $0x80] sm:$0xff]  ;;  %v3281_v34 = vld [vmem:[%s3821_s8 + $0x58] sm:$0xff]  ;;  %v3319_v36 = vld [vmem:[%s4708_s1 + $0x30] sm:$0xff] }
  0x17   : > { %v3320_v35 = vld [vmem:[%s4708_s1 + $0x38] sm:$0xff]  ;;  %v3318_v38 = vld [vmem:[%s4708_s1 + $0x28] sm:$0xff]  ;;  %v3266_v39 = vld [vmem:[%s3821_s8 + $0x20] sm:$0xff] }
  0x18   : > { %417 = vmatpush.bf16.msra.mxu0 %v3274_v8  ;;  %3670 = vmatpush.bf16.msra.mxu3 %v3320_v35  ;;  %v3297_v37 = vld [vmem:[%s3821_s8 + $0x98] sm:$0xff]  ;;  %v3282_v40 = vld [vmem:[%s3821_s8 + $0x60] sm:$0xff]  ;;  %v3315_v44 = vld [vmem:[%s4708_s1 + $0x10] sm:$0xff] }
  0x19   : > { %682 = vmatpush.bf16.msra.mxu1 %v3290_v9  ;;  %v3317_v41 = vld [vmem:[%s4708_s1 + $0x20] sm:$0xff]  ;;  %v3316_v42 = vld [vmem:[%s4708_s1 + $0x18] sm:$0xff]  ;;  %v3314_v45 = vld [vmem:[%s4708_s1 + $0x8] sm:$0xff] }
  0x1a   : > { %947 = vmatpush.bf16.msra.mxu2 %v3306_v15  ;;  %v3298_v43 = vld [vmem:[%s3821_s8 + $0xa0] sm:$0xff]  ;;  %v3267_v46 = vld [vmem:[%s3821_s8 + $0x28] sm:$0xff]  ;;  %v3328_v49 = vld [vmem:[%s4712_s5 + $0x38] sm:$0xff] }
  0x1b   : > { %v3283_v47 = vld [vmem:[%s3821_s8 + $0x68] sm:$0xff]  ;;  %v3313_v48 = vld [vmem:[%s4708_s1] sm:$0xff]  ;;  %v3327_v50 = vld [vmem:[%s4712_s5 + $0x30] sm:$0xff] }
  0x1c   : > { %418 = vmatpush.bf16.msra.mxu0 %v3273_v10  ;;  %3671 = vmatpush.bf16.msra.mxu3 %v3319_v36  ;;  %v3299_v51 = vld [vmem:[%s3821_s8 + $0xa8] sm:$0xff]  ;;  %v3325_v53 = vld [vmem:[%s4712_s5 + $0x20] sm:$0xff]  ;;  %v3268_v54 = vld [vmem:[%s3821_s8 + $0x30] sm:$0xff] }
  0x1d   : > { %683 = vmatpush.bf16.msra.mxu1 %v3289_v11  ;;  %v3326_v52 = vld [vmem:[%s4712_s5 + $0x28] sm:$0xff]  ;;  %v3284_v55 = vld [vmem:[%s3821_s8 + $0x70] sm:$0xff]  ;;  %v3324_v57 = vld [vmem:[%s4712_s5 + $0x18] sm:$0xff] }
  0x1e   : > { %948 = vmatpush.bf16.msra.mxu2 %v3305_v18  ;;  %v3311_v56 = vld [vmem:[%s3821_s8 + $0xc8] sm:$0xff]  ;;  %v3323_v58 = vld [vmem:[%s4712_s5 + $0x10] sm:$0xff]  ;;  %v3336_v59 = vld [vmem:[%s4712_s5 + $0x78] sm:$0xff] }
  0x1f   : > { %v3300_v60 = vld [vmem:[%s3821_s8 + $0xb0] sm:$0xff]  ;;  %v3322_v61 = vld [vmem:[%s4712_s5 + $0x8] sm:$0xff]  ;;  %v3360_v62 = vld [vmem:[%s4712_s5 + $0x78] sm:$0xff] }
  0x20   : > { %419 = vmatpush.bf16.msra.mxu0 %v3272_v13  ;;  %3672 = vmatpush.bf16.msra.mxu3 %v3318_v38  ;;  %v3335_v63 = vld [vmem:[%s4712_s5 + $0x70] sm:$0xff]  ;;  %v3321_v0 = vld [vmem:[%s4712_s5] sm:$0xff]  ;;  %v3269_v2 = vld [vmem:[%s3821_s8 + $0x38] sm:$0xff] }
  0x21   : > { %684 = vmatpush.bf16.msra.mxu1 %v3288_v14  ;;  %v3359_v1 = vld [vmem:[%s4712_s5 + $0x70] sm:$0xff]  ;;  %v3285_v3 = vld [vmem:[%s3821_s8 + $0x78] sm:$0xff]  ;;  %v3334_v5 = vld [vmem:[%s4712_s5 + $0x68] sm:$0xff] }
  0x22   : > { %949 = vmatpush.bf16.msra.mxu2 %v3304_v21  ;;  %v3312_v4 = vld [vmem:[%s3821_s8 + $0xd0] sm:$0xff]  ;;  %v3358_v6 = vld [vmem:[%s4712_s5 + $0x68] sm:$0xff]  ;;  %v3333_v7 = vld [vmem:[%s4712_s5 + $0x60] sm:$0xff] }
  0x23   : > { %v3357_v8 = vld [vmem:[%s4712_s5 + $0x60] sm:$0xff]  ;;  %v3332_v9 = vld [vmem:[%s4712_s5 + $0x58] sm:$0xff]  ;;  %v3331_v12 = vld [vmem:[%s4712_s5 + $0x50] sm:$0xff] }
  0x24   : > { %420 = vmatpush.bf16.msra.mxu0 %v3271_v16  ;;  %3673 = vmatpush.bf16.msra.mxu3 %v3317_v41  ;;  %v3301_v10 = vld [vmem:[%s3821_s8 + $0xb8] sm:$0xff]  ;;  %v3355_v13 = vld [vmem:[%s4712_s5 + $0x50] sm:$0xff]  ;;  %v3310_v14 = vld [vmem:[%s3821_s8 + $0xc0] sm:$0xff] }
  0x25   : > { %685 = vmatpush.bf16.msra.mxu1 %v3287_v17  ;;  %v3356_v11 = vld [vmem:[%s4712_s5 + $0x58] sm:$0xff]  ;;  %v3330_v17 = vld [vmem:[%s4712_s5 + $0x48] sm:$0xff]  ;;  %v3329_v21 = vld [vmem:[%s4712_s5 + $0x40] sm:$0xff] }
  0x26   : > { %950 = vmatpush.bf16.msra.mxu2 %v3303_v24  ;;  %v3344_v18 = vld [vmem:[%s4712_s5 + $0xb8] sm:$0xff] }
  0x28   : > { %421 = vmatpush.bf16.msra.mxu0 %v3270_v19  ;;  %3674 = vmatpush.bf16.msra.mxu3 %v3316_v42  ;;  %v3354_v19 = vld [vmem:[%s4712_s5 + $0x48] sm:$0xff] }
  0x29   : > { %686 = vmatpush.bf16.msra.mxu1 %v3286_v20  ;;  %v3957_v20 = vld [vmem:[%s4709_s2] ss:$0 sm:$0xff] }
  0x2a   : > { %951 = vmatpush.bf16.msra.mxu2 %v3302_v25  ;;  %v3972_v25 = vld [vmem:[%s4710_s3] ss:$0 sm:$0xff] }
  0x2b   : > { %422 = vmatmul.bf16.vlgmr.msra.gmra.mxu0 %v3262_v22  ;;  %v3343_v22 = vld [vmem:[%s4712_s5 + $0xb0] sm:$0xff] }
  0x2c   : > { %687 = vmatmul.bf16.vlgmr.msra.gmra.mxu1 %v3278_v23  ;;  %1169 = vmatpush.bf16.msrb.mxu0 %v3320_v35  ;;  %v3353_v23 = vld [vmem:[%s4712_s5 + $0x40] sm:$0xff]  ;;  %v3352_v35 = vld [vmem:[%s4712_s5 + $0x38] sm:$0xff] }
  0x2d   : > { %952 = vmatmul.bf16.vlgmr.msra.gmra.mxu2 %v3294_v26  ;;  %3675 = vmatpush.bf16.msra.mxu3 %v3315_v44  ;;  %v3394_v26 = vld [vmem:[%s4711_s4] sm:$0xff]  }
  0x2e   : > { %1824 = vmatpush.bf16.msrb.mxu2 %v3360_v62  ;;  %1576 = vmatpush.bf16.msrb.mxu1 %v3344_v18  ;;  %v3630_v62 = vld [vmem:[%s4711_s4 + $0x50] sm:$0xff]  }
  0x30   : > { %1170 = vmatpush.bf16.msrb.mxu0 %v3319_v36  ;;  %v3341_v36 = vld [vmem:[%s4712_s5 + $0xa0] sm:$0xff] }
  0x31   : > { %3676 = vmatpush.bf16.msra.mxu3 %v3314_v45 }
  0x32   : > { %1825 = vmatpush.bf16.msrb.mxu2 %v3359_v1  ;;  %1577 = vmatpush.bf16.msrb.mxu1 %v3343_v22 }
  0x34   : > { %1171 = vmatpush.bf16.msrb.mxu0 %v3318_v38 }
  0x35   : > { %3677 = vmatpush.bf16.msra.mxu3 %v3313_v48 }
  0x36   : > { %1826 = vmatpush.bf16.msrb.mxu2 %v3358_v6 }
  0x38   : > { %1172 = vmatpush.bf16.msrb.mxu0 %v3317_v41  ;;  %1182 = vmatmul.bf16.vlgmr.msra.gmra.mxu3 %v3311_v56  ;;  %v3340_v41 = vld [vmem:[%s4712_s5 + $0x98] sm:$0xff] }
  0x39   : > { %1342 = vmatpush.bf16.msrb.mxu3 %v3336_v59  ;;  %v3622_v59 = vld [vmem:[%s4711_s4 + $0x10] sm:$0xff]  }
  0x3a   : > { %1827 = vmatpush.bf16.msrb.mxu2 %v3357_v8 }
  0x3b   : > { %427 = vmatmul.bf16.gmra.mxu0 %v3263_v27 }
  0x3c   : > { %692 = vmatmul.bf16.gmra.mxu1 %v3279_v28  ;;  %1173 = vmatpush.bf16.msrb.mxu0 %v3316_v42 }
  0x3d   : > { %957 = vmatmul.bf16.gmra.mxu2 %v3295_v29  ;;  %1343 = vmatpush.bf16.msrb.mxu3 %v3335_v63  ;;  %v3342_v29 = vld [vmem:[%s4712_s5 + $0xa8] sm:$0xff] }
  0x3e   : > { %1828 = vmatpush.bf16.msrb.mxu2 %v3356_v11  ;;  %1578 = vmatpush.bf16.msrb.mxu1 %v3342_v29  ;;  %v3631_v29 = vld [vmem:[%s4711_s4 + $0x58] sm:$0xff]  }
  0x40   : > { %1174 = vmatpush.bf16.msrb.mxu0 %v3315_v44  ;;  %v4002_v44 = vld [vmem:[%s4709_s2] ss:$0 sm:$0xff] }
  0x41   : > { %1344 = vmatpush.bf16.msrb.mxu3 %v3334_v5 }
  0x42   : > { %1829 = vmatpush.bf16.msrb.mxu2 %v3355_v13  ;;  %1579 = vmatpush.bf16.msrb.mxu1 %v3341_v36 }
  0x44   : > { %1175 = vmatpush.bf16.msrb.mxu0 %v3314_v45 }
  0x45   : > { %1345 = vmatpush.bf16.msrb.mxu3 %v3333_v7  ;;  %v3435_v7 = vunpack.c.l.bf16 %v3630_v62 }
  0x46   : > { %1830 = vmatpush.bf16.msrb.mxu2 %v3354_v19  ;;  %1580 = vmatpush.bf16.msrb.mxu1 %v3340_v41 }
  0x48   : > { %1176 = vmatpush.bf16.msrb.mxu0 %v3313_v48  ;;  %1187 = vmatmul.bf16.gmra.mxu3 %v3312_v4  ;;  %v3621_v48 = vld [vmem:[%s4711_s4 + $0x8] sm:$0xff]  }
  0x49   : > { %1346 = vmatpush.bf16.msrb.mxu3 %v3332_v9  ;;  %v3399_v56 = vunpack.c.l.bf16 %v3621_v48 }
  0x4a   : > { %1831 = vmatpush.bf16.msrb.mxu2 %v3353_v23 }
  0x4b   : > { %432 = vmatmul.bf16.gmra.mxu0 %v3264_v30 }
  0x4c   : > { %697 = vmatmul.bf16.gmra.mxu1 %v3280_v31  ;;  %1439 = vmatpush.bf16.msra.mxu0 %v3328_v49  ;;  %v3396_v31 = vunpack.c.h.bf16 %v3394_v26  ;;  %v3338_v49 = vld [vmem:[%s4712_s5 + $0x88] sm:$0xff] }
  0x4d   : > { %962 = vmatmul.bf16.gmra.mxu2 %v3296_v32  ;;  %1347 = vmatpush.bf16.msrb.mxu3 %v3331_v12 }
  0x50   : > { %1440 = vmatpush.bf16.msra.mxu0 %v3327_v50 }
  0x51   : > { %1348 = vmatpush.bf16.msrb.mxu3 %v3330_v17 }
  0x54   : > { %1441 = vmatpush.bf16.msra.mxu0 %v3326_v52  ;;  %v4015_v52 = vld [vmem:[%s4710_s3] ss:$0 sm:$0xff] }
  0x55   : > { %1349 = vmatpush.bf16.msrb.mxu3 %v3329_v21  ;;  %v3404_v21 = vunpack.c.h.bf16 %v3622_v59 }
  0x58   : > { %1442 = vmatpush.bf16.msra.mxu0 %v3325_v53 }
  0x59   : > { %1921 = vmatpush.bf16.msra.mxu3 %v3352_v35 }
  0x5b   : > { %437 = vmatmul.bf16.gmra.mxu0 %v3265_v33  ;;  %v3395_v33 = vunpack.c.l.bf16 %v3394_v26 }
  0x5c   : > { %702 = vmatmul.bf16.gmra.mxu1 %v3281_v34  ;;  %1443 = vmatpush.bf16.msra.mxu0 %v3324_v57  ;;  %v4023_v57 = vld [vmem:[%s4711_s4 + $0x48] sm:$0xff]  }
  0x5d   : > { %967 = vmatmul.bf16.gmra.mxu2 %v3297_v37 }
  0x60   : > { %1444 = vmatpush.bf16.msra.mxu0 %v3323_v58  ;;  %v3337_v58 = vld [vmem:[%s4712_s5 + $0x80] sm:$0xff] }
  0x64   : > { %1445 = vmatpush.bf16.msra.mxu0 %v3322_v61  ;;  %v3351_v61 = vld [vmem:[%s4712_s5 + $0x30] sm:$0xff] }
  0x65   : > { %1922 = vmatpush.bf16.msra.mxu3 %v3351_v61 }
  0x68   : > { %1446 = vmatpush.bf16.msra.mxu0 %v3321_v0  ;;  %v3432_v0 = vunpack.c.h.bf16 %v4023_v57 }
  0x6b   : > { %442 = vmatmul.bf16.gmra.mxu0 %v3266_v39 }
  0x6c   : > { %707 = vmatmul.bf16.gmra.mxu1 %v3282_v40 }
  0x6d   : > { %972 = vmatmul.bf16.gmra.mxu2 %v3298_v43  ;;  %v3339_v43 = vld [vmem:[%s4712_s5 + $0x90] sm:$0xff] }
  0x6e   : > { %1581 = vmatpush.bf16.msrb.mxu1 %v3339_v43 }
  0x72   : > { %1582 = vmatpush.bf16.msrb.mxu1 %v3338_v49 }
  0x76   : > { %1583 = vmatpush.bf16.msrb.mxu1 %v3337_v58 }
  0x7b   : > { %447 = vmatmul.bf16.gmra.mxu0 %v3267_v46 }
  0x7c   : > { %712 = vmatmul.bf16.gmra.mxu1 %v3283_v47 }
  0x7d   : > { %977 = vmatmul.bf16.gmra.mxu2 %v3299_v51  ;;  %v3400_v51 = vunpack.c.h.bf16 %v3621_v48 }
  0x8b   : > { %452 = vmatmul.bf16.gmra.mxu0 %v3268_v54 }
  0x8c   : > { %717 = vmatmul.bf16.gmra.mxu1 %v3284_v55 }
  0x8d   : > { %982 = vmatmul.bf16.gmra.mxu2 %v3300_v60 }
  0x9b   : > { %457 = vmatmul.bf16.gmra.mxu0 %v3269_v2 }
  0x9c   : > { %722 = vmatmul.bf16.gmra.mxu1 %v3285_v3  ;;  %v3403_v3 = vunpack.c.l.bf16 %v3622_v59  ;;  %v3349_v59 = vld [vmem:[%s4712_s5 + $0x20] sm:$0xff] }
  0x9d   : > { %987 = vmatmul.bf16.gmra.mxu2 %v3301_v10 }
  0xa8   : > { %v423_v15 = vpop.f32.mrf.mxu0 }
  0xa9   : > { %v3943_v16 = vpop.f32.mrf.mxu1  ;;  %v424_v24 = vadd.f32 %v3957_v20, %v423_v15 }
  0xab   : > { %1177 = vmatmul.bf16.vlgmr.msrb.gmra.mxu0 %v3310_v14  ;;  %v467_v32 = vmax.f32 %v424_v24, %v3972_v25  ;;  %v3350_v24 = vld [vmem:[%s4712_s5 + $0x28] sm:$0xff] }
  0xac   : > { %1923 = vmatpush.bf16.msra.mxu3 %v3350_v24 }
  0xad   : > { %v515_v38 = vmul.f32 %v3395_v33, %v467_v32 }
  0xb0   : > { %v425_v27 = vpop.f32.mrf.mxu0  ;;  %1924 = vmatpush.bf16.msra.mxu3 %v3349_v59 }
  0xb1   : > { %v3977_v28 = vpop.f32.mrf.mxu1  ;;  %v426_v30 = vadd.f32 %v3957_v20, %v425_v27  ;;  %v3623_v27 = vld [vmem:[%s4711_s4 + $0x18] sm:$0xff]  }
  0xb3   : > { %v468_v34 = vmax.f32 %v426_v30, %v3972_v25 }
  0xb5   : > { %v516_v37 = vmul.f32 %v3396_v31, %v468_v34  ;;  %v3436_v31 = vunpack.c.h.bf16 %v3630_v62  ;;  %v3407_v34 = vunpack.c.l.bf16 %v3623_v27 }
  0xb7   : > { %v1243_v42 = vpack.c.bf16 %v516_v37, %v515_v38  ;;  %v3439_v38 = vunpack.c.l.bf16 %v3631_v29 }
  0xb8   : > { %v428_v39 = vpop.f32.mrf.mxu0 }
  0xb9   : > { %v3991_v40 = vpop.f32.mrf.mxu1  ;;  %v429_v45 = vadd.f32 %v3957_v20, %v428_v39  ;;  %v4064_v39 = vpop.f32.mrf.mxu2 }
  0xbb   : > { %1447 = vmatmul.bf16.vlgmr.msra.gmra.mxu0 %v1243_v42  ;;  %v469_v53 = vmax.f32 %v429_v45, %v3972_v25 }
  0xbd   : > { %v517_v1 = vmul.f32 %v3399_v56, %v469_v53  ;;  %v3408_v53 = vunpack.c.h.bf16 %v3623_v27  ;;  %v3348_v27 = vld [vmem:[%s4712_s5 + $0x18] sm:$0xff] }
  0xbe   : > { %1925 = vmatpush.bf16.msra.mxu3 %v3348_v27 }
  0xc0   : > { %v430_v46 = vpop.f32.mrf.mxu0 }
  0xc1   : > { %v695_v47 = vpop.f32.mrf.mxu1  ;;  %v431_v50 = vadd.f32 %v3957_v20, %v430_v46 }
  0xc2   : > { %v696_v55 = vadd.f32 %v4002_v44, %v695_v47 }
  0xc3   : > { %v470_v54 = vmax.f32 %v431_v50, %v3972_v25 }
  0xc4   : > { %v735_v63 = vmax.f32 %v696_v55, %v4015_v52  ;;  %v3440_v55 = vunpack.c.h.bf16 %v3631_v29 }
  0xc5   : > { %v518_v60 = vmul.f32 %v3400_v51, %v470_v54 }
  0xc6   : > { %v4041_v9 = vmul.f32 %v3432_v0, %v735_v63  ;;  %v3624_v63 = vld [vmem:[%s4711_s4 + $0x20] sm:$0xff]  }
  0xc7   : > { %v1244_v8 = vpack.c.bf16 %v518_v60, %v517_v1  ;;  %v3632_v0 = vld [vmem:[%s4711_s4 + $0x60] sm:$0xff]  }
  0xc8   : > { %v433_v2 = vpop.f32.mrf.mxu0 }
  0xc9   : > { %v698_v4 = vpop.f32.mrf.mxu1  ;;  %v434_v5 = vadd.f32 %v3957_v20, %v433_v2 }
  0xca   : > { %v699_v6 = vadd.f32 %v4002_v44, %v698_v4 }
  0xcb   : > { %v471_v10 = vmax.f32 %v434_v5, %v3972_v25  ;;  %1452 = vmatmul.bf16.gmra.mxu0 %v1244_v8  ;;  %v3443_v8 = vunpack.c.l.bf16 %v3632_v0 }
  0xcc   : > { %v736_v11 = vmax.f32 %v699_v6, %v4015_v52 }
  0xcd   : > { %v519_v12 = vmul.f32 %v3403_v3, %v471_v10 }
  0xce   : > { %v4045_v13 = vmul.f32 %v3435_v7, %v736_v11  ;;  %v3411_v7 = vunpack.c.l.bf16 %v3624_v63 }
  0xcf   : > { %v1270_v14 = vpack.c.bf16 %v519_v12, %v518_v60  ;;  %v4078_v60 = vpop.f32.mrf.mxu2 }
  0xd0   : > { %v1752_v15 = vpack.c.bf16 %v4045_v13, %v4041_v9  ;;  %v435_v17 = vpop.f32.mrf.mxu0 }
  0xd1   : > { %v700_v18 = vpop.f32.mrf.mxu1  ;;  %v436_v19 = vadd.f32 %v3957_v20, %v435_v17  ;;  %1350 = vmatmul.bf16.vlgmr.msrb.gmra.mxu3 %v1270_v14 }
  0xd2   : > { %1832 = vmatmul.bf16.vlgmr.msrb.gmra.mxu2 %v1752_v15  ;;  %v701_v23 = vadd.f32 %v4002_v44, %v700_v18 }
  0xd3   : > { %v472_v22 = vmax.f32 %v436_v19, %v3972_v25 }
  0xd4   : > { %v737_v30 = vmax.f32 %v701_v23, %v4015_v52  ;;  %v3412_v23 = vunpack.c.h.bf16 %v3624_v63 }
  0xd5   : > { %v520_v26 = vmul.f32 %v3404_v21, %v472_v22 }
  0xd6   : > { %v4068_v43 = vmul.f32 %v3436_v31, %v737_v30  ;;  %v3625_v30 = vld [vmem:[%s4711_s4 + $0x28] sm:$0xff]  }
  0xd7   : > { %v1245_v37 = vpack.c.bf16 %v520_v26, %v519_v12  ;;  %v4094_v15 = vpop.f32.mrf.mxu2  ;;  %v3633_v31 = vld [vmem:[%s4711_s4 + $0x68] sm:$0xff]  }
  0xd8   : > { %v438_v32 = vpop.f32.mrf.mxu0 }
  0xd9   : > { %v703_v33 = vpop.f32.mrf.mxu1  ;;  %v439_v35 = vadd.f32 %v3957_v20, %v438_v32 }
  0xda   : > { %v704_v36 = vadd.f32 %v4002_v44, %v703_v33 }
  0xdb   : > { %v473_v41 = vmax.f32 %v439_v35, %v3972_v25  ;;  %1457 = vmatmul.bf16.gmra.mxu0 %v1245_v37 }
  0xdc   : > { %v738_v42 = vmax.f32 %v704_v36, %v4015_v52 }
  0xdd   : > { %v521_v45 = vmul.f32 %v3407_v34, %v473_v41  ;;  %v3444_v34 = vunpack.c.h.bf16 %v3632_v0 }
  0xde   : > { %v786_v46 = vmul.f32 %v3439_v38, %v738_v42  ;;  %v3415_v42 = vunpack.c.l.bf16 %v3625_v30 }
  0xdf   : > { %v1271_v47 = vpack.c.bf16 %v521_v45, %v520_v26  ;;  %v4110_v37 = vpop.f32.mrf.mxu2 }
  0xe0   : > { %v1753_v48 = vpack.c.bf16 %v786_v46, %v4068_v43  ;;  %v440_v49 = vpop.f32.mrf.mxu0 }
  0xe1   : > { %v705_v50 = vpop.f32.mrf.mxu1  ;;  %v441_v51 = vadd.f32 %v3957_v20, %v440_v49  ;;  %1355 = vmatmul.bf16.gmra.mxu3 %v1271_v47 }
  0xe2   : > { %v706_v54 = vadd.f32 %v4002_v44, %v705_v50  ;;  %1837 = vmatmul.bf16.gmra.mxu2 %v1753_v48 }
  0xe3   : > { %v474_v56 = vmax.f32 %v441_v51, %v3972_v25 }
  0xe4   : > { %v739_v58 = vmax.f32 %v706_v54, %v4015_v52 }
  0xe5   : > { %v522_v61 = vmul.f32 %v3408_v53, %v474_v56  ;;  %v3367_v53 = vld [vmem:[%s4712_s5 + $0xb0] sm:$0xff] }
  0xe6   : > { %v787_v62 = vmul.f32 %v3440_v55, %v739_v58 }
  0xe7   : > { %v1246_v1 = vpack.c.bf16 %v522_v61, %v521_v45  ;;  %v3447_v45 = vunpack.c.l.bf16 %v3633_v31  ;;  %v4132_v63 = vpop.f32.mrf.mxu2 }
  0xe8   : > { %v4086_v2 = vpack.c.bf16 %v787_v62, %v786_v46  ;;  %v443_v3 = vpop.f32.mrf.mxu0  ;;  %v3368_v46 = vld [vmem:[%s4712_s5 + $0xb8] sm:$0xff] }
  0xe9   : > { %v708_v4 = vpop.f32.mrf.mxu1  ;;  %v444_v5 = vadd.f32 %v3957_v20, %v443_v3  ;;  %1584 = vmatmul.bf16.vlgmr.msrb.gmra.mxu1 %v1246_v1  ;;  %2058 = vmatpush.bf16.msrb.mxu0 %v3368_v46 }
  0xea   : > { %v709_v6 = vadd.f32 %v4002_v44, %v708_v4  ;;  %v3347_v4 = vld [vmem:[%s4712_s5 + $0x10] sm:$0xff] }
  0xeb   : > { %v475_v10 = vmax.f32 %v444_v5, %v3972_v25  ;;  %1462 = vmatmul.bf16.gmra.mxu0 %v1246_v1  ;;  %v4142_v5 = vld [vmem:[%s4711_s4 + $0x70] sm:$0xff]   ;;  %1926 = vmatpush.bf16.msra.mxu3 %v3347_v4  ;;  %v4206_v4 = vld [vmem:[%s4711_s4 + $0x78] sm:$0xff]  }
  0xec   : > { %v740_v11 = vmax.f32 %v709_v6, %v4015_v52  ;;  %v3626_v6 = vld [vmem:[%s4711_s4 + $0x30] sm:$0xff]  }
  0xed   : > { %v523_v12 = vmul.f32 %v3411_v7, %v475_v10  ;;  %2059 = vmatpush.bf16.msrb.mxu0 %v3367_v53  ;;  %v3365_v7 = vld [vmem:[%s4712_s5 + $0xa0] sm:$0xff]  ;;  %v3448_v10 = vunpack.c.h.bf16 %v3633_v31  ;;  %v3376_v53 = vld [vmem:[%s4712_s5 + $0x38] sm:$0xff] }
  0xee   : > { %v4092_v14 = vmul.f32 %v3443_v8, %v740_v11  ;;  %2403 = vmatpush.bf16.msra.mxu2 %v3376_v53 }
  0xef   : > { %v1272_v17 = vpack.c.bf16 %v523_v12, %v522_v61  ;;  %v3416_v61 = vunpack.c.h.bf16 %v3625_v30  ;;  %v1183_v30 = vpop.f32.mrf.mxu3  ;;  %v4166_v31 = vpop.f32.mrf.mxu2 }
  0xf0   : > { %v1754_v18 = vpack.c.bf16 %v4092_v14, %v787_v62  ;;  %v445_v19 = vpop.f32.mrf.mxu0  ;;  %v3366_v62 = vld [vmem:[%s4712_s5 + $0xa8] sm:$0xff] }
  0xf1   : > { %v710_v21 = vpop.f32.mrf.mxu1  ;;  %v446_v22 = vadd.f32 %v3957_v20, %v445_v19  ;;  %1360 = vmatmul.bf16.gmra.mxu3 %v1272_v17  ;;  %2060 = vmatpush.bf16.msrb.mxu0 %v3366_v62  ;;  %v4197_v62 = vld [vmem:[%s4711_s4 + $0x38] sm:$0xff]  }
  0xf2   : > { %1842 = vmatmul.bf16.gmra.mxu2 %v1754_v18  ;;  %v711_v26 = vadd.f32 %v4002_v44, %v710_v21  ;;  %v3451_v21 = vunpack.c.l.bf16 %v4142_v5 }
  0xf3   : > { %v476_v24 = vmax.f32 %v446_v22, %v3972_v25  ;;  %v3419_v22 = vunpack.c.l.bf16 %v3626_v6 }
  0xf4   : > { %v741_v32 = vmax.f32 %v711_v26, %v4015_v52 }
  0xf5   : > { %v524_v29 = vmul.f32 %v3412_v23, %v476_v24  ;;  %2061 = vmatpush.bf16.msrb.mxu0 %v3365_v7  ;;  %v3364_v23 = vld [vmem:[%s4712_s5 + $0x98] sm:$0xff]  ;;  %v3375_v7 = vld [vmem:[%s4712_s5 + $0x30] sm:$0xff] }
  0xf6   : > { %v4119_v49 = vmul.f32 %v3444_v34, %v741_v32  ;;  %v3363_v34 = vld [vmem:[%s4712_s5 + $0x90] sm:$0xff]  ;;  %2404 = vmatpush.bf16.msra.mxu2 %v3375_v7 }
  0xf7   : > { %v1247_v33 = vpack.c.bf16 %v524_v29, %v523_v12  ;;  %v3646_v7 = vld [vmem:[%s4711_s4 + $0xd0] sm:$0xff]  }
  0xf8   : > { %v448_v35 = vpop.f32.mrf.mxu0 }
  0xf9   : > { %v713_v36 = vpop.f32.mrf.mxu1  ;;  %v449_v38 = vadd.f32 %v3957_v20, %v448_v35  ;;  %1589 = vmatmul.bf16.gmra.mxu1 %v1247_v33  ;;  %2062 = vmatpush.bf16.msrb.mxu0 %v3364_v23 }
  0xfa   : > { %v714_v41 = vadd.f32 %v4002_v44, %v713_v36 }
  0xfb   : > { %v477_v47 = vmax.f32 %v449_v38, %v3972_v25  ;;  %1467 = vmatmul.bf16.gmra.mxu0 %v1247_v33 }
  0xfc   : > { %v742_v48 = vmax.f32 %v714_v41, %v4015_v52 }
  0xfd   : > { %v525_v50 = vmul.f32 %v3415_v42, %v477_v47  ;;  %v4178_v42 = vld [vmem:[%s4710_s3] ss:$0 sm:$0xff]  ;;  %2063 = vmatpush.bf16.msrb.mxu0 %v3363_v34  ;;  %v3420_v47 = vunpack.c.h.bf16 %v3626_v6 }
  0xfe   : > { %v4121_v51 = vmul.f32 %v3447_v45, %v742_v48  ;;  %v3645_v48 = vld [vmem:[%s4711_s4 + $0xc8] sm:$0xff]   ;;  %v3361_v6 = vld [vmem:[%s4712_s5 + $0x80] sm:$0xff] }
  0xff   : > { %v1273_v54 = vpack.c.bf16 %v525_v50, %v524_v29  ;;  %v4164_v29 = vld [vmem:[%s4709_s2] ss:$0 sm:$0xff] }
 0x100   : > { %v1755_v55 = vpack.c.bf16 %v4121_v51, %v4119_v49  ;;  %v450_v56 = vpop.f32.mrf.mxu0  ;;  %v1184_v45 = vadd.f32 %v4164_v29, %v1183_v30  ;;  %v3374_v30 = vld [vmem:[%s4712_s5 + $0x28] sm:$0xff] }
 0x101   : > { %v715_v58 = vpop.f32.mrf.mxu1  ;;  %v451_v59 = vadd.f32 %v3957_v20, %v450_v56  ;;  %1365 = vmatmul.bf16.gmra.mxu3 %v1273_v54  ;;  %2405 = vmatpush.bf16.msra.mxu2 %v3374_v30 }
 0x102   : > { %1847 = vmatmul.bf16.gmra.mxu2 %v1755_v55  ;;  %v716_v1 = vadd.f32 %v4002_v44, %v715_v58  ;;  %v1199_v56 = vmax.f32 %v1184_v45, %v4178_v42  ;;  %v3495_v58 = vunpack.c.l.bf16 %v3645_v48 }
 0x103   : > { %v478_v0 = vmax.f32 %v451_v59, %v3972_v25  ;;  %v1185_v59 = vpop.f32.mrf.mxu3 }
 0x104   : > { %v743_v8 = vmax.f32 %v716_v1, %v4015_v52  ;;  %v1186_v1 = vadd.f32 %v4164_v29, %v1185_v59 }
 0x105   : > { %v526_v3 = vmul.f32 %v3416_v61, %v478_v0  ;;  %v3346_v0 = vld [vmem:[%s4712_s5 + $0x8] sm:$0xff] }
 0x106   : > { %v4157_v24 = vmul.f32 %v3448_v10, %v743_v8  ;;  %v4214_v8 = vpop.f32.mrf.mxu2  ;;  %1927 = vmatpush.bf16.msra.mxu3 %v3346_v0 }
 0x107   : > { %v1248_v11 = vpack.c.bf16 %v526_v3, %v525_v50  ;;  %v3362_v50 = vld [vmem:[%s4712_s5 + $0x88] sm:$0xff] }
 0x108   : > { %v453_v12 = vpop.f32.mrf.mxu0  ;;  %2064 = vmatpush.bf16.msrb.mxu0 %v3362_v50 }
 0x109   : > { %v718_v17 = vpop.f32.mrf.mxu1  ;;  %v454_v18 = vadd.f32 %v3957_v20, %v453_v12  ;;  %1594 = vmatmul.bf16.gmra.mxu1 %v1248_v11 }
 0x10a   : > { %v719_v19 = vadd.f32 %v4002_v44, %v718_v17  ;;  %v1200_v17 = vmax.f32 %v1186_v1, %v4178_v42 }
 0x10b   : > { %v479_v26 = vmax.f32 %v454_v18, %v3972_v25  ;;  %1472 = vmatmul.bf16.gmra.mxu0 %v1248_v11  ;;  %v3452_v11 = vunpack.c.h.bf16 %v4142_v5 }
 0x10c   : > { %v744_v27 = vmax.f32 %v719_v19, %v4015_v52  ;;  %2065 = vmatpush.bf16.msrb.mxu0 %v3361_v6 }
 0x10d   : > { %v527_v33 = vmul.f32 %v3419_v22, %v479_v26  ;;  %v4220_v22 = vmul.f32 %v3495_v58, %v1199_v56 }
 0x10e   : > { %v4168_v32 = vmul.f32 %v3451_v21, %v744_v27  ;;  %v3423_v21 = vunpack.c.l.bf16 %v4197_v62  ;;  %v3455_v27 = vunpack.c.l.bf16 %v4206_v4  ;;  %v4262_v0 = vpop.f32.mrf.mxu2 }
 0x10f   : > { %v1274_v35 = vpack.c.bf16 %v527_v33, %v526_v3  ;;  %v3496_v3 = vunpack.c.h.bf16 %v3645_v48  ;;  %v3373_v48 = vld [vmem:[%s4712_s5 + $0x20] sm:$0xff] }
 0x110   : > { %v1756_v36 = vpack.c.bf16 %v4168_v32, %v4157_v24  ;;  %v455_v38 = vpop.f32.mrf.mxu0  ;;  %2406 = vmatpush.bf16.msra.mxu2 %v3373_v48 }
 0x111   : > { %v720_v41 = vpop.f32.mrf.mxu1  ;;  %v456_v46 = vadd.f32 %v3957_v20, %v455_v38  ;;  %1370 = vmatmul.bf16.gmra.mxu3 %v1274_v35  ;;  %v4225_v5 = vmul.f32 %v3496_v3, %v1200_v17  ;;  %v4239_v38 = vld [vmem:[%s4709_s2] ss:$0 sm:$0xff]  ;;  %v3424_v3 = vunpack.c.h.bf16 %v4197_v62  ;;  %v3499_v17 = vunpack.c.l.bf16 %v3646_v7 }
 0x112   : > { %1852 = vmatmul.bf16.gmra.mxu2 %v1756_v36  ;;  %v721_v55 = vadd.f32 %v4002_v44, %v720_v41 }
 0x113   : > { %v480_v54 = vmax.f32 %v456_v46, %v3972_v25  ;;  %v2474_v36 = vpack.c.bf16 %v4225_v5, %v4220_v22  ;;  %v1188_v46 = vpop.f32.mrf.mxu3 }
 0x114   : > { %v745_v10 = vmax.f32 %v721_v55, %v4015_v52  ;;  %v4257_v55 = vld [vmem:[%s4711_s4 + $0x80] sm:$0xff]  }
 0x115   : > { %v528_v61 = vmul.f32 %v3420_v47, %v480_v54  ;;  %v1189_v47 = vadd.f32 %v4164_v29, %v1188_v46  ;;  %v4252_v54 = vld [vmem:[%s4710_s3] ss:$0 sm:$0xff] }
 0x117   : > { %v1249_v12 = vpack.c.bf16 %v528_v61, %v527_v33  ;;  %v4230_v33 = vmul.f32 %v3452_v11, %v745_v10  ;;  %v1201_v59 = vmax.f32 %v1189_v47, %v4178_v42  ;;  %v3345_v10 = vld [vmem:[%s4712_s5] sm:$0xff] }
 0x118   : > { %v458_v18 = vpop.f32.mrf.mxu0  ;;  %1928 = vmatpush.bf16.msra.mxu3 %v3345_v10  ;;  %v3628_v11 = vld [vmem:[%s4711_s4 + $0x40] sm:$0xff]  }
 0x119   : > { %v723_v19 = vpop.f32.mrf.mxu1  ;;  %v459_v23 = vadd.f32 %v3957_v20, %v458_v18  ;;  %1599 = vmatmul.bf16.gmra.mxu1 %v1249_v12  ;;  %v4293_v47 = vmul.f32 %v3499_v17, %v1201_v59  ;;  %v691_v59 = vadd.f32 %v4002_v44, %v3977_v28  ;;  %v3369_v28 = vld [vmem:[%s4712_s5] sm:$0xff]  ;;  %v3637_v17 = vld [vmem:[%s4711_s4 + $0x88] sm:$0xff]  }
 0x11a   : > { %v724_v26 = vadd.f32 %v4002_v44, %v723_v19 }
 0x11b   : > { %v481_v34 = vmax.f32 %v459_v23, %v3972_v25  ;;  %1477 = vmatmul.bf16.gmra.mxu0 %v1249_v12  ;;  %v3459_v12 = vunpack.c.l.bf16 %v4257_v55  ;;  %v3456_v23 = vunpack.c.h.bf16 %v4206_v4  ;;  %v3384_v4 = vld [vmem:[%s4712_s5 + $0x78] sm:$0xff] }
 0x11c   : > { %v746_v35 = vmax.f32 %v724_v26, %v4015_v52  ;;  %v1190_v26 = vpop.f32.mrf.mxu3  ;;  %2306 = vmatpush.bf16.msra.mxu1 %v3384_v4 }
 0x11d   : > { %v529_v45 = vmul.f32 %v3423_v21, %v481_v34 }
 0x11e   : > { %v4241_v41 = vmul.f32 %v3455_v27, %v746_v35  ;;  %v3371_v27 = vld [vmem:[%s4712_s5 + $0x10] sm:$0xff]  ;;  %v3427_v35 = vunpack.c.l.bf16 %v3628_v11 }
 0x11f   : > { %v1275_v50 = vpack.c.bf16 %v529_v45, %v528_v61  ;;  %v954_v61 = vadd.f32 %v4239_v38, %v4064_v39  ;;  %v3372_v39 = vld [vmem:[%s4712_s5 + $0x18] sm:$0xff] }
 0x120   : > { %v1757_v53 = vpack.c.bf16 %v4241_v41, %v4230_v33  ;;  %v460_v56 = vpop.f32.mrf.mxu0  ;;  %2407 = vmatpush.bf16.msra.mxu2 %v3372_v39 }
 0x121   : > { %v725_v58 = vpop.f32.mrf.mxu1  ;;  %v461_v1 = vadd.f32 %v3957_v20, %v460_v56  ;;  %1375 = vmatmul.bf16.gmra.mxu3 %v1275_v50  ;;  %v689_v20 = vadd.f32 %v4002_v44, %v3943_v16  ;;  %v997_v18 = vmax.f32 %v954_v61, %v4252_v54  ;;  %v1191_v16 = vadd.f32 %v4164_v29, %v1190_v26  ;;  %v4314_v61 = vpop.f32.mrf.mxu2 }
 0x122   : > { %1857 = vmatmul.bf16.gmra.mxu2 %v1757_v53  ;;  %v726_v6 = vadd.f32 %v4002_v44, %v725_v58  ;;  %v3370_v58 = vld [vmem:[%s4712_s5 + $0x8] sm:$0xff]  ;;  %v3463_v26 = vunpack.c.l.bf16 %v3637_v17 }
 0x123   : > { %v482_v62 = vmax.f32 %v461_v1, %v3972_v25  ;;  %v3500_v25 = vunpack.c.h.bf16 %v3646_v7  ;;  %v732_v30 = vmax.f32 %v689_v20, %v4015_v52  ;;  %v1202_v48 = vmax.f32 %v1191_v16, %v4178_v42  ;;  %v3382_v20 = vld [vmem:[%s4712_s5 + $0x68] sm:$0xff] }
 0x124   : > { %v747_v21 = vmax.f32 %v726_v6, %v4015_v52  ;;  %2408 = vmatpush.bf16.msra.mxu2 %v3371_v27  ;;  %v4299_v50 = vmul.f32 %v3459_v12, %v997_v18  ;;  %v733_v6 = vmax.f32 %v691_v59, %v4015_v52  ;;  %v3428_v7 = vunpack.c.h.bf16 %v3628_v11  ;;  %v3392_v11 = vld [vmem:[%s4712_s5 + $0xb8] sm:$0xff] }
 0x125   : > { %v530_v19 = vmul.f32 %v3424_v3, %v482_v62  ;;  %v4307_v56 = vmul.f32 %v3500_v25, %v1202_v48  ;;  %v780_v1 = vmul.f32 %v3427_v35, %v732_v30  ;;  %v3383_v3 = vld [vmem:[%s4712_s5 + $0x70] sm:$0xff]  ;;  %v956_v62 = vadd.f32 %v4239_v38, %v4078_v60  ;;  %2540 = vmatpush.bf16.msrb.mxu3 %v3392_v11  ;;  %v3381_v60 = vld [vmem:[%s4712_s5 + $0x60] sm:$0xff]  ;;  %v3380_v30 = vld [vmem:[%s4712_s5 + $0x58] sm:$0xff] }
 0x126   : > { %v4301_v53 = vmul.f32 %v3456_v23, %v747_v21  ;;  %2307 = vmatpush.bf16.msra.mxu1 %v3383_v3  ;;  %v959_v12 = vadd.f32 %v4239_v38, %v4094_v15  ;;  %v781_v18 = vmul.f32 %v3428_v7, %v733_v6  ;;  %v3460_v21 = vunpack.c.h.bf16 %v4257_v55 }
 0x127   : > { %v1250_v34 = vpack.c.bf16 %v530_v19, %v529_v45  ;;  %v4305_v45 = vpack.c.bf16 %v4119_v49, %v4092_v14  ;;  %v2475_v14 = vpack.c.bf16 %v4307_v56, %v4293_v47  ;;  %v1276_v10 = vpack.c.bf16 %v780_v1, %v530_v19 }
 0x128   : > { %v4291_v46 = vpop.f32.mrf.mxu0  ;;  %2409 = vmatpush.bf16.msra.mxu2 %v3370_v58  ;;  %v1758_v49 = vpack.c.bf16 %v4299_v50, %v4301_v53  ;;  %v694_v19 = vadd.f32 %v4002_v44, %v3991_v40  ;;  %v998_v15 = vmax.f32 %v956_v62, %v4252_v54  ;;  %v999_v23 = vmax.f32 %v959_v12, %v4252_v54 }
 0x129   : > { %1604 = vmatmul.bf16.gmra.mxu1 %v1250_v34  ;;  %v4350_v16 = vpop.f32.mrf.mxu2  ;;  %v1509_v27 = vpack.c.bf16 %v781_v18, %v780_v1  ;;  %v3431_v40 = vunpack.c.l.bf16 %v4023_v57  ;;  %v4361_v55 = vpack.c.bf16 %v4157_v24, %v4121_v51  ;;  %v3379_v57 = vld [vmem:[%s4712_s5 + $0x50] sm:$0xff]  ;;  %v3378_v51 = vld [vmem:[%s4712_s5 + $0x48] sm:$0xff]  ;;  %v3377_v1 = vld [vmem:[%s4712_s5 + $0x40] sm:$0xff]  ;;  %v4387_v6 = vpack.c.bf16 %v4230_v33, %v4168_v32 }
 0x12a   : > { %2308 = vmatpush.bf16.msra.mxu1 %v3382_v20  ;;  %v734_v25 = vmax.f32 %v694_v19, %v4015_v52  ;;  %v1047_v35 = vmul.f32 %v3463_v26, %v999_v23  ;;  %v3391_v24 = vld [vmem:[%s4712_s5 + $0xb0] sm:$0xff]  ;;  %v961_v20 = vadd.f32 %v4239_v38, %v4110_v37  ;;  %v3464_v32 = vunpack.c.h.bf16 %v3637_v17 }
 0x12b   : > { %1482 = vmatmul.bf16.gmra.mxu0 %v1250_v34  ;;  %v1046_v34 = vmul.f32 %v3460_v21, %v998_v15  ;;  %2541 = vmatpush.bf16.msrb.mxu3 %v3391_v24  ;;  %v1511_v33 = vpack.c.bf16 %v4068_v43, %v4045_v13  ;;  %v964_v37 = vadd.f32 %v4239_v38, %v4132_v63  ;;  %v3638_v13 = vld [vmem:[%s4711_s4 + $0x90] sm:$0xff]  }
 0x12c   : > { %2410 = vmatpush.bf16.msra.mxu2 %v3369_v28  ;;  %v782_v52 = vmul.f32 %v3431_v40, %v734_v25  ;;  %v1000_v12 = vmax.f32 %v961_v20, %v4252_v54  ;;  %v4412_v19 = vpack.c.bf16 %v4301_v53, %v4241_v41  ;;  %v966_v41 = vadd.f32 %v4239_v38, %v4166_v31 }
 0x12d   : > { %v1759_v48 = vpack.c.bf16 %v1047_v35, %v1046_v34  ;;  %v4391_v7 = vpack.c.bf16 %v1046_v34, %v4299_v50  ;;  %v3390_v50 = vld [vmem:[%s4712_s5 + $0xa8] sm:$0xff]  ;;  %v1001_v17 = vmax.f32 %v964_v37, %v4252_v54  ;;  %v3389_v34 = vld [vmem:[%s4712_s5 + $0xa0] sm:$0xff] }
 0x12e   : > { %2309 = vmatpush.bf16.msra.mxu1 %v3381_v60  ;;  %v1277_v58 = vpack.c.bf16 %v782_v52, %v781_v18  ;;  %v1510_v3 = vpack.c.bf16 %v4041_v9, %v782_v52  ;;  %v1048_v18 = vmul.f32 %v3464_v32, %v1000_v12  ;;  %v3467_v60 = vunpack.c.l.bf16 %v3638_v13 }
 0x12f   : > { %2542 = vmatpush.bf16.msrb.mxu3 %v3390_v50  ;;  %v1002_v25 = vmax.f32 %v966_v41, %v4252_v54  ;;  %v969_v52 = vadd.f32 %v4239_v38, %v4214_v8 }
 0x130   : > { %v4327_v39 = vpop.f32.mrf.mxu0  ;;  %v4421_v63 = vpack.c.bf16 %v1048_v18, %v1047_v35  ;;  %v1049_v23 = vmul.f32 %v3467_v60, %v1001_v17 }
 0x131   : > { %1380 = vmatmul.bf16.gmra.mxu3 %v1276_v10  ;;  %v4367_v4 = vpop.f32.mrf.mxu2  ;;  %v1003_v8 = vmax.f32 %v969_v52, %v4252_v54 }
 0x132   : > { %1862 = vmatmul.bf16.gmra.mxu2 %v1758_v49  ;;  %2310 = vmatpush.bf16.msra.mxu1 %v3380_v30  ;;  %v2234_v26 = vpack.c.bf16 %v1049_v23, %v1048_v18  ;;  %v971_v18 = vadd.f32 %v4239_v38, %v4262_v0 }
 0x133   : > { %2543 = vmatpush.bf16.msrb.mxu3 %v3389_v34 }
 0x134   : > { %v1004_v60 = vmax.f32 %v971_v18, %v4252_v54 }
 0x136   : > { %2311 = vmatpush.bf16.msra.mxu1 %v3379_v57 }
 0x138   : > { %v4354_v44 = vpop.f32.mrf.mxu0 }
 0x139   : > { %1609 = vmatmul.bf16.gmra.mxu1 %v1509_v27  ;;  %v4383_v28 = vpop.f32.mrf.mxu2 }
 0x13a   : > { %2312 = vmatpush.bf16.msra.mxu1 %v3378_v51  ;;  %v4447_v51 = vld [vmem:[%s4713_s6] ss:$0 sm:$0xff] }
 0x13b   : > { %2066 = vmatmul.bf16.vlgmr.msrb.gmra.mxu0 %v4086_v2 }
 0x13e   : > { %2313 = vmatpush.bf16.msra.mxu1 %v3377_v1 }
 0x140   : > { %v4369_v59 = vpop.f32.mrf.mxu0 }
 0x141   : > { %1385 = vmatmul.bf16.gmra.mxu3 %v1277_v58  ;;  %v4398_v9 = vpop.f32.mrf.mxu2 }
 0x142   : > { %1867 = vmatmul.bf16.gmra.mxu2 %v1759_v48  ;;  %v3639_v48 = vld [vmem:[%s4711_s4 + $0x98] sm:$0xff]  }
 0x143   : > { %v3471_v1 = vunpack.c.l.bf16 %v3639_v48  ;;  %v3472_v0 = vunpack.c.h.bf16 %v3639_v48 }
 0x145   : > { %v1051_v50 = vmul.f32 %v3471_v1, %v1003_v8 }
 0x148   : > { %v4381_v49 = vpop.f32.mrf.mxu0 }
 0x149   : > { %1614 = vmatmul.bf16.gmra.mxu1 %v1510_v3  ;;  %v4419_v15 = vpop.f32.mrf.mxu2 }
 0x14b   : > { %2071 = vmatmul.bf16.gmra.mxu0 %v4305_v45 }
 0x150   : > { %v4393_v10 = vpop.f32.mrf.mxu0 }
 0x151   : > { %1929 = vmatmul.bf16.vlgmr.msra.gmra.mxu3 %v1509_v27  ;;  %v3468_v27 = vunpack.c.h.bf16 %v3638_v13  ;;  %v4431_v30 = vpop.f32.mrf.mxu2 }
 0x152   : > { %2411 = vmatmul.bf16.vlgmr.msra.gmra.mxu2 %v4391_v7 }
 0x153   : > { %v1050_v31 = vmul.f32 %v3468_v27, %v1002_v25  ;;  %v1052_v27 = vmul.f32 %v3472_v0, %v1004_v60 }
 0x154   : > { %v1351_v62 = vpop.f32.mrf.mxu3 }
 0x155   : > { %v1449_v57 = vadd.f32 %v4354_v44, %v1351_v62  ;;  %v2235_v41 = vpack.c.bf16 %v1051_v50, %v1050_v31 }
 0x158   : > { %v4406_v11 = vpop.f32.mrf.mxu0 }
 0x159   : > { %1619 = vmatmul.bf16.gmra.mxu1 %v1511_v33  ;;  %v4459_v37 = vpop.f32.mrf.mxu2 }
 0x15b   : > { %2076 = vmatmul.bf16.gmra.mxu0 %v4361_v55 }
 0x15c   : > { %v1353_v43 = vpop.f32.mrf.mxu3 }
 0x15d   : > { %v1451_v44 = vadd.f32 %v4369_v59, %v1353_v43 }
 0x160   : > { %v4423_v21 = vpop.f32.mrf.mxu0 }
 0x161   : > { %1934 = vmatmul.bf16.gmra.mxu3 %v1510_v3  ;;  %v4452_v3 = vpack.c.bf16 %v1050_v31, %v1049_v23  ;;  %v3640_v31 = vld [vmem:[%s4711_s4 + $0xa0] sm:$0xff]   ;;  %v4481_v52 = vpop.f32.mrf.mxu2 }
 0x162   : > { %2416 = vmatmul.bf16.gmra.mxu2 %v4421_v63  ;;  %v3475_v8 = vunpack.c.l.bf16 %v3640_v31 }
 0x164   : > { %v1356_v53 = vpop.f32.mrf.mxu3 }
 0x165   : > { %v1454_v34 = vadd.f32 %v4381_v49, %v1356_v53 }
 0x166   : > { %v1585_v40 = vpop.f32.mrf.mxu1 }
 0x167   : > { %v1625_v58 = vadd.f32 %v1585_v40, %v1449_v57  ;;  %v974_v40 = vadd.f32 %v4239_v38, %v4314_v61  ;;  %v4486_v61 = vpack.c.bf16 %v1052_v27, %v1051_v50 }
 0x168   : > { %v4436_v35 = vpop.f32.mrf.mxu0 }
 0x169   : > { %2314 = vmatmul.bf16.vlgmr.msra.gmra.mxu1 %v2234_v26  ;;  %v1645_v62 = vadd.f32 %v4447_v51, %v1625_v58  ;;  %v1005_v58 = vmax.f32 %v974_v40, %v4252_v54 }
 0x16b   : > { %2081 = vmatmul.bf16.gmra.mxu0 %v4387_v6  ;;  %v1661_v59 = vmax.f32 %v1645_v62, 0.0  ;;  %v1053_v62 = vmul.f32 %v3475_v8, %v1005_v58 }
 0x16c   : > { %v1358_v24 = vpop.f32.mrf.mxu3 }
 0x16d   : > { %v1456_v1 = vadd.f32 %v4393_v10, %v1358_v24  ;;  %v2236_v0 = vpack.c.bf16 %v1053_v62, %v1052_v27  ;;  %v3641_v27 = vld [vmem:[%s4711_s4 + $0xa8] sm:$0xff]  }
 0x16e   : > { %v1587_v20 = vpop.f32.mrf.mxu1 }
 0x16f   : > { %v1626_v12 = vadd.f32 %v1587_v20, %v1451_v44 }
 0x170   : > { %v4455_v32 = vpop.f32.mrf.mxu0 }
 0x171   : > { %v1646_v13 = vadd.f32 %v4447_v51, %v1626_v12  ;;  %1939 = vmatmul.bf16.gmra.mxu3 %v1511_v33  ;;  %v3388_v33 = vld [vmem:[%s4712_s5 + $0x98] sm:$0xff]  ;;  %v976_v12 = vadd.f32 %v4239_v38, %v4350_v16  ;;  %v3387_v16 = vld [vmem:[%s4712_s5 + $0x90] sm:$0xff] }
 0x172   : > { %2421 = vmatmul.bf16.gmra.mxu2 %v4452_v3  ;;  %2544 = vmatpush.bf16.msrb.mxu3 %v3388_v33 }
 0x173   : > { %v1662_v43 = vmax.f32 %v1646_v13, 0.0  ;;  %v1006_v13 = vmax.f32 %v976_v12, %v4252_v54 }
 0x174   : > { %v1361_v17 = vpop.f32.mrf.mxu3 }
 0x175   : > { %v3504_v23 = vpack.c.bf16 %v1662_v43, %v1661_v59  ;;  %v3476_v59 = vunpack.c.h.bf16 %v3640_v31  ;;  %v4497_v43 = vpop.f32.mrf.mxu2  ;;  %v1459_v33 = vadd.f32 %v4406_v11, %v1361_v17 }
 0x176   : > { %v1590_v26 = vpop.f32.mrf.mxu1  ;;  %2545 = vmatpush.bf16.msrb.mxu3 %v3387_v16  ;;  %v3642_v16 = vld [vmem:[%s4711_s4 + $0xb0] sm:$0xff]  }
 0x177   : > { %3505 = vst [vmem:[%s4466_s26] sm:$0xff] %v3504_v23   ;;  %v1627_v57 = vadd.f32 %v1590_v26, %v1454_v34  ;;  %v979_v26 = vadd.f32 %v4239_v38, %v4367_v4 }
 0x178   : > { %v4473_v25 = vpop.f32.mrf.mxu0 }
 0x179   : > { %2319 = vmatmul.bf16.gmra.mxu1 %v2235_v41  ;;  %v1647_v53 = vadd.f32 %v4447_v51, %v1627_v57  ;;  %v1007_v31 = vmax.f32 %v979_v26, %v4252_v54  ;;  %v3479_v57 = vunpack.c.l.bf16 %v3641_v27 }
 0x17b   : > { %2086 = vmatmul.bf16.gmra.mxu0 %v4412_v19  ;;  %v1663_v10 = vmax.f32 %v1647_v53, 0.0  ;;  %v1055_v53 = vmul.f32 %v3479_v57, %v1007_v31 }
 0x17c   : > { %v1363_v48 = vpop.f32.mrf.mxu3 }
 0x17d   : > { %v1461_v58 = vadd.f32 %v4423_v21, %v1363_v48 }
 0x17e   : > { %v1592_v49 = vpop.f32.mrf.mxu1 }
 0x17f   : > { %v1628_v44 = vadd.f32 %v1592_v49, %v1456_v1  ;;  %v4516_v1 = vpop.f32.mrf.mxu2 }
 0x180   : > { %v4489_v20 = vpop.f32.mrf.mxu0 }
 0x181   : > { %v1648_v18 = vadd.f32 %v4447_v51, %v1628_v44  ;;  %1944 = vmatmul.bf16.gmra.mxu3 %v4086_v2  ;;  %v1054_v2 = vmul.f32 %v3476_v59, %v1006_v13 }
 0x182   : > { %2426 = vmatmul.bf16.gmra.mxu2 %v4486_v61 }
 0x183   : > { %v1664_v24 = vmax.f32 %v1648_v18, 0.0  ;;  %v4514_v8 = vpack.c.bf16 %v1054_v2, %v1053_v62  ;;  %v3480_v18 = vunpack.c.h.bf16 %v3641_v27  ;;  %v3483_v27 = vunpack.c.l.bf16 %v3642_v16 }
 0x184   : > { %v1366_v50 = vpop.f32.mrf.mxu3 }
 0x185   : > { %v3509_v60 = vpack.c.bf16 %v1664_v24, %v1663_v10  ;;  %v2237_v24 = vpack.c.bf16 %v1055_v53, %v1054_v2 }
 0x186   : > { %v1595_v23 = vpop.f32.mrf.mxu1 }
 0x187   : > { %3647 = vst [vmem:[%s4466_s26 + $0x8] sm:$0xff] %v3509_v60   ;;  %v1629_v40 = vadd.f32 %v1595_v23, %v1459_v33  ;;  %v1464_v23 = vadd.f32 %v4436_v35, %v1366_v50 }
 0x188   : > { %v4503_v41 = vpop.f32.mrf.mxu0 }
 0x189   : > { %2324 = vmatmul.bf16.gmra.mxu1 %v2236_v0  ;;  %v1649_v11 = vadd.f32 %v4447_v51, %v1629_v40  ;;  %v4535_v0 = vpop.f32.mrf.mxu2 }
 0x18b   : > { %2091 = vmatmul.bf16.gmra.mxu0 %v4391_v7  ;;  %v981_v7 = vadd.f32 %v4239_v38, %v4383_v28  ;;  %v1665_v21 = vmax.f32 %v1649_v11, 0.0  ;;  %v3386_v28 = vld [vmem:[%s4712_s5 + $0x88] sm:$0xff] }
 0x18c   : > { %v1368_v34 = vpop.f32.mrf.mxu3  ;;  %2546 = vmatpush.bf16.msrb.mxu3 %v3386_v28 }
 0x18d   : > { %v1008_v12 = vmax.f32 %v981_v7, %v4252_v54  ;;  %v1466_v40 = vadd.f32 %v4455_v32, %v1368_v34  ;;  %v3484_v7 = vunpack.c.h.bf16 %v3642_v16 }
 0x18e   : > { %v1597_v4 = vpop.f32.mrf.mxu1 }
 0x18f   : > { %v1630_v17 = vadd.f32 %v1597_v4, %v1461_v58  ;;  %v1056_v60 = vmul.f32 %v3480_v18, %v1008_v12  ;;  %v986_v4 = vadd.f32 %v4239_v38, %v4419_v15  ;;  %v3385_v15 = vld [vmem:[%s4712_s5 + $0x80] sm:$0xff]  ;;  %v989_v18 = vadd.f32 %v4239_v38, %v4431_v30 }
 0x190   : > { %v4519_v49 = vpop.f32.mrf.mxu0  ;;  %2547 = vmatpush.bf16.msrb.mxu3 %v3385_v15 }
 0x191   : > { %v1650_v44 = vadd.f32 %v4447_v51, %v1630_v17  ;;  %1949 = vmatmul.bf16.gmra.mxu3 %v4305_v45  ;;  %v984_v45 = vadd.f32 %v4239_v38, %v4398_v9  ;;  %v4544_v9 = vpack.c.bf16 %v1056_v60, %v1055_v53  ;;  %v4554_v32 = vpop.f32.mrf.mxu2  ;;  %v1010_v53 = vmax.f32 %v986_v4, %v4252_v54 }
 0x192   : > { %2431 = vmatmul.bf16.gmra.mxu2 %v4514_v8 }
 0x193   : > { %v1666_v48 = vmax.f32 %v1650_v44, 0.0  ;;  %v1009_v33 = vmax.f32 %v984_v45, %v4252_v54 }
 0x194   : > { %v1371_v62 = vpop.f32.mrf.mxu3 }
 0x195   : > { %v3514_v10 = vpack.c.bf16 %v1666_v48, %v1665_v21  ;;  %v1057_v58 = vmul.f32 %v3483_v27, %v1009_v33 }
 0x196   : > { %v1600_v13 = vpop.f32.mrf.mxu1 }
 0x197   : > { %3648 = vst [vmem:[%s4466_s26 + $0x10] sm:$0xff] %v3514_v10   ;;  %v1631_v2 = vadd.f32 %v1600_v13, %v1464_v23  ;;  %v2238_v21 = vpack.c.bf16 %v1057_v58, %v1056_v60  ;;  %v1469_v10 = vadd.f32 %v4473_v25, %v1371_v62  ;;  %v1011_v60 = vmax.f32 %v989_v18, %v4252_v54 }
 0x198   : > { %v4531_v59 = vpop.f32.mrf.mxu0 }
 0x199   : > { %2329 = vmatmul.bf16.gmra.mxu1 %v2237_v24  ;;  %v1651_v35 = vadd.f32 %v4447_v51, %v1631_v2  ;;  %v3643_v24 = vld [vmem:[%s4711_s4 + $0xb8] sm:$0xff]   ;;  %v4571_v23 = vpop.f32.mrf.mxu2 }
 0x19a   : > { %v3487_v45 = vunpack.c.l.bf16 %v3643_v24 }
 0x19b   : > { %2096 = vmatmul.bf16.gmra.mxu0 %v4421_v63  ;;  %v1667_v34 = vmax.f32 %v1651_v35, 0.0 }
 0x19c   : > { %v1373_v26 = vpop.f32.mrf.mxu3  ;;  %v1059_v27 = vmul.f32 %v3487_v45, %v1011_v60 }
 0x19d   : > { %v1471_v16 = vadd.f32 %v4489_v20, %v1373_v26 }
 0x19e   : > { %v1602_v31 = vpop.f32.mrf.mxu1 }
 0x19f   : > { %v1632_v50 = vadd.f32 %v1602_v31, %v1466_v40 }
 0x1a0   : > { %v4547_v57 = vpop.f32.mrf.mxu0 }
 0x1a1   : > { %v1652_v63 = vadd.f32 %v4447_v51, %v1632_v50  ;;  %1954 = vmatmul.bf16.gmra.mxu3 %v4361_v55  ;;  %v1058_v55 = vmul.f32 %v3484_v7, %v1010_v53  ;;  %v3488_v50 = vunpack.c.h.bf16 %v3643_v24 }
 0x1a2   : > { %2436 = vmatmul.bf16.gmra.mxu2 %v4544_v9 }
 0x1a3   : > { %v1668_v11 = vmax.f32 %v1652_v63, 0.0  ;;  %v4574_v30 = vpack.c.bf16 %v1058_v55, %v1057_v58  ;;  %v2239_v4 = vpack.c.bf16 %v1059_v27, %v1058_v55 }
 0x1a4   : > { %v1376_v17 = vpop.f32.mrf.mxu3 }
 0x1a5   : > { %v3519_v44 = vpack.c.bf16 %v1668_v11, %v1667_v34  ;;  %v4585_v34 = vpop.f32.mrf.mxu2 }
 0x1a6   : > { %v1605_v48 = vpop.f32.mrf.mxu1 }
 0x1a7   : > { %3649 = vst [vmem:[%s4466_s26 + $0x18] sm:$0xff] %v3519_v44   ;;  %v1633_v13 = vadd.f32 %v1605_v48, %v1469_v10 }
 0x1a8   : > { %v4561_v12 = vpop.f32.mrf.mxu0 }
 0x1a9   : > { %2334 = vmatmul.bf16.gmra.mxu1 %v2238_v21  ;;  %v1653_v62 = vadd.f32 %v4447_v51, %v1633_v13 }
 0x1ab   : > { %2101 = vmatmul.bf16.gmra.mxu0 %v4452_v3  ;;  %v991_v3 = vadd.f32 %v4239_v38, %v4459_v37  ;;  %v1669_v20 = vmax.f32 %v1653_v62, 0.0  ;;  %v1179_v38 = vadd.f32 %v4164_v29, %v4291_v46  ;;  %v1181_v62 = vadd.f32 %v4164_v29, %v4327_v39 }
 0x1ac   : > { %v1378_v28 = vpop.f32.mrf.mxu3 }
 0x1ad   : > { %v1012_v35 = vmax.f32 %v991_v3, %v4252_v54  ;;  %v3644_v54 = vld [vmem:[%s4711_s4 + $0xc0] sm:$0xff]   ;;  %v1197_v44 = vmax.f32 %v1179_v38, %v4178_v42  ;;  %v1476_v48 = vadd.f32 %v4519_v49, %v1378_v28 }
 0x1ae   : > { %v1607_v25 = vpop.f32.mrf.mxu1  ;;  %v3491_v21 = vunpack.c.l.bf16 %v3644_v54 }
 0x1af   : > { %v1634_v2 = vadd.f32 %v1607_v25, %v1471_v16  ;;  %v1060_v37 = vmul.f32 %v3488_v50, %v1012_v35 }
 0x1b0   : > { %v4577_v33 = vpop.f32.mrf.mxu0 }
 0x1b1   : > { %v1654_v40 = vadd.f32 %v4447_v51, %v1634_v2  ;;  %1959 = vmatmul.bf16.gmra.mxu3 %v4387_v6  ;;  %v1474_v6 = vadd.f32 %v4503_v41, %v1376_v17  ;;  %v4596_v15 = vpack.c.bf16 %v1060_v37, %v1059_v27  ;;  %v4599_v41 = vmul.f32 %v3491_v21, %v1197_v44  ;;  %v4601_v17 = vpop.f32.mrf.mxu2 }
 0x1b2   : > { %2441 = vmatmul.bf16.gmra.mxu2 %v4574_v30 }
 0x1b3   : > { %v1670_v26 = vmax.f32 %v1654_v40, 0.0  ;;  %v2240_v45 = vpack.c.bf16 %v4599_v41, %v1060_v37 }
 0x1b4   : > { %v1381_v31 = vpop.f32.mrf.mxu3 }
 0x1b5   : > { %v3524_v58 = vpack.c.bf16 %v1670_v26, %v1669_v20  ;;  %v1479_v25 = vadd.f32 %v4531_v59, %v1381_v31  ;;  %v1198_v20 = vmax.f32 %v1181_v62, %v4178_v42  ;;  %v3492_v26 = vunpack.c.h.bf16 %v3644_v54 }
 0x1b6   : > { %v1610_v63 = vpop.f32.mrf.mxu1 }
 0x1b7   : > { %3650 = vst [vmem:[%s4466_s26 + $0x20] sm:$0xff] %v3524_v58   ;;  %v1635_v53 = vadd.f32 %v1610_v63, %v1474_v6  ;;  %v4616_v59 = vmul.f32 %v3492_v26, %v1198_v20 }
 0x1b8   : > { %v2067_v11 = vpop.f32.mrf.mxu0 }
 0x1b9   : > { %2339 = vmatmul.bf16.gmra.mxu1 %v2239_v4  ;;  %v1655_v46 = vadd.f32 %v4447_v51, %v1635_v53  ;;  %v2241_v42 = vpack.c.bf16 %v4220_v22, %v4616_v59 }
 0x1bb   : > { %v1671_v13 = vmax.f32 %v1655_v46, 0.0 }
 0x1bc   : > { %v1383_v7 = vpop.f32.mrf.mxu3 }
 0x1bd   : > { %v1481_v3 = vadd.f32 %v4547_v57, %v1383_v7 }
 0x1be   : > { %v1612_v55 = vpop.f32.mrf.mxu1 }
 0x1bf   : > { %v1636_v18 = vadd.f32 %v1612_v55, %v1476_v48 }
 0x1c0   : > { %v2069_v24 = vpop.f32.mrf.mxu0 }
 0x1c1   : > { %v1656_v10 = vadd.f32 %v4447_v51, %v1636_v18  ;;  %1964 = vmatmul.bf16.gmra.mxu3 %v4412_v19 }
 0x1c2   : > { %2446 = vmatmul.bf16.gmra.mxu2 %v4596_v15 }
 0x1c3   : > { %v1672_v49 = vmax.f32 %v1656_v10, 0.0 }
 0x1c4   : > { %v1386_v28 = vpop.f32.mrf.mxu3 }
 0x1c5   : > { %v3529_v60 = vpack.c.bf16 %v1672_v49, %v1671_v13  ;;  %v1484_v37 = vadd.f32 %v4561_v12, %v1386_v28  ;;  %v1853_v49 = vpop.f32.mrf.mxu2 }
 0x1c6   : > { %v1615_v16 = vpop.f32.mrf.mxu1 }
 0x1c7   : > { %3651 = vst [vmem:[%s4466_s26 + $0x28] sm:$0xff] %v3529_v60   ;;  %v1637_v2 = vadd.f32 %v1615_v16, %v1479_v25 }
 0x1c8   : > { %v2072_v27 = vpop.f32.mrf.mxu0 }
 0x1c9   : > { %2344 = vmatmul.bf16.gmra.mxu1 %v2240_v45  ;;  %v1657_v35 = vadd.f32 %v4447_v51, %v1637_v2 }
 0x1cb   : > { %v1673_v29 = vmax.f32 %v1657_v35, 0.0 }
 0x1cc   : > { %v1388_v19 = vpop.f32.mrf.mxu3 }
 0x1cd   : > { %v1486_v7 = vadd.f32 %v4577_v33, %v1388_v19  ;;  %v1855_v2 = vpop.f32.mrf.mxu2 }
 0x1ce   : > { %v1617_v40 = vpop.f32.mrf.mxu1 }
 0x1cf   : > { %v1638_v50 = vadd.f32 %v1617_v40, %v1481_v3 }
 0x1d0   : > { %v2074_v63 = vpop.f32.mrf.mxu0 }
 0x1d1   : > { %v1658_v58 = vadd.f32 %v4447_v51, %v1638_v50  ;;  %2548 = vmatmul.bf16.vlgmr.msrb.gmra.mxu3 %v4486_v61  ;;  %v4626_v61 = vld [vmem:[%s4713_s6] ss:$0 sm:$0xff] }
 0x1d3   : > { %v1674_v39 = vmax.f32 %v1658_v58, 0.0 }
 0x1d4   : > { %v1930_v31 = vpop.f32.mrf.mxu3 }
 0x1d5   : > { %v3534_v4 = vpack.c.bf16 %v1674_v39, %v1673_v29  ;;  %v1931_v57 = vadd.f32 %v1930_v31, %v4481_v52  ;;  %v1858_v50 = vpop.f32.mrf.mxu2 }
 0x1d6   : > { %v1620_v38 = vpop.f32.mrf.mxu1 }
 0x1d7   : > { %3652 = vst [vmem:[%s4466_s26 + $0x30] sm:$0xff] %v3534_v4   ;;  %v2107_v6 = vadd.f32 %v2067_v11, %v1931_v57  ;;  %v1639_v53 = vadd.f32 %v1620_v38, %v1484_v37 }
 0x1d8   : > { %v2077_v55 = vpop.f32.mrf.mxu0 }
 0x1d9   : > { %2349 = vmatmul.bf16.gmra.mxu1 %v2241_v42  ;;  %v2127_v52 = vadd.f32 %v4626_v61, %v2107_v6  ;;  %v1659_v48 = vadd.f32 %v4447_v51, %v1639_v53 }
 0x1db   : > { %v2143_v10 = vmax.f32 %v2127_v52, 0.0  ;;  %v1675_v33 = vmax.f32 %v1659_v48, 0.0 }
 0x1dc   : > { %v1932_v54 = vpop.f32.mrf.mxu3 }
 0x1dd   : > { %v1933_v44 = vadd.f32 %v1932_v54, %v4497_v43 }
 0x1de   : > { %v1622_v21 = vpop.f32.mrf.mxu1 }
 0x1df   : > { %v2108_v12 = vadd.f32 %v2069_v24, %v1933_v44  ;;  %v1640_v11 = vadd.f32 %v1622_v21, %v1486_v7 }
 0x1e0   : > { %v2079_v16 = vpop.f32.mrf.mxu0 }
 0x1e1   : > { %v2128_v46 = vadd.f32 %v4626_v61, %v2108_v12  ;;  %v1660_v18 = vadd.f32 %v4447_v51, %v1640_v11  ;;  %2553 = vmatmul.bf16.gmra.mxu3 %v4514_v8 }
 0x1e3   : > { %v2144_v13 = vmax.f32 %v2128_v46, 0.0  ;;  %v1676_v43 = vmax.f32 %v1660_v18, 0.0 }
 0x1e4   : > { %v1935_v28 = vpop.f32.mrf.mxu3 }
 0x1e5   : > { %v3544_v60 = vpack.c.bf16 %v2144_v13, %v2143_v10  ;;  %v3539_v45 = vpack.c.bf16 %v1676_v43, %v1675_v33  ;;  %v1936_v24 = vadd.f32 %v1935_v28, %v4516_v1  ;;  %v2473_v28 = vpack.c.bf16 %v4616_v59, %v4599_v41 }
 0x1e7   : > { %3654 = vst [vmem:[%s4466_s26 + $0x40] sm:$0xff] %v3544_v60   ;;  %v2109_v25 = vadd.f32 %v2072_v27, %v1936_v24 }
 0x1e8   : > { %3653 = vst [vmem:[%s4466_s26 + $0x38] sm:$0xff] %v3539_v45   ;;  %v2082_v26 = vpop.f32.mrf.mxu0 }
 0x1e9   : > { %v2129_v8 = vadd.f32 %v4626_v61, %v2109_v25 }
 0x1eb   : > { %v2145_v40 = vmax.f32 %v2129_v8, 0.0 }
 0x1ec   : > { %v1937_v62 = vpop.f32.mrf.mxu3 }
 0x1ed   : > { %v1938_v51 = vadd.f32 %v1937_v62, %v4535_v0 }
 0x1ef   : > { %v2110_v19 = vadd.f32 %v2074_v63, %v1938_v51  ;;  %v1860_v63 = vpop.f32.mrf.mxu2 }
 0x1f0   : > { %v2084_v39 = vpop.f32.mrf.mxu0 }
 0x1f1   : > { %v2130_v3 = vadd.f32 %v4626_v61, %v2110_v19  ;;  %2558 = vmatmul.bf16.gmra.mxu3 %v4544_v9 }
 0x1f3   : > { %v2146_v20 = vmax.f32 %v2130_v3, 0.0 }
 0x1f4   : > { %v1940_v35 = vpop.f32.mrf.mxu3 }
 0x1f5   : > { %v3549_v1 = vpack.c.bf16 %v2146_v20, %v2145_v40  ;;  %v1941_v27 = vadd.f32 %v1940_v35, %v4554_v32  ;;  %v2315_v20 = vpop.f32.mrf.mxu1 }
 0x1f7   : > { %3655 = vst [vmem:[%s4466_s26 + $0x48] sm:$0xff] %v3549_v1   ;;  %v2111_v58 = vadd.f32 %v2077_v55, %v1941_v27 }
 0x1f8   : > { %v2087_v6 = vpop.f32.mrf.mxu0 }
 0x1f9   : > { %v2131_v31 = vadd.f32 %v4626_v61, %v2111_v58 }
 0x1fb   : > { %v2147_v38 = vmax.f32 %v2131_v31, 0.0 }
 0x1fc   : > { %v1942_v0 = vpop.f32.mrf.mxu3 }
 0x1fd   : > { %v1943_v29 = vadd.f32 %v1942_v0, %v4571_v23  ;;  %v1863_v23 = vpop.f32.mrf.mxu2 }
 0x1ff   : > { %v2112_v4 = vadd.f32 %v2079_v16, %v1943_v29 }
 0x200   : > { %v2089_v52 = vpop.f32.mrf.mxu0 }
 0x201   : > { %v2132_v9 = vadd.f32 %v4626_v61, %v2112_v4  ;;  %2563 = vmatmul.bf16.gmra.mxu3 %v4574_v30 }
 0x203   : > { %v2148_v57 = vmax.f32 %v2132_v9, 0.0 }
 0x204   : > { %v1945_v42 = vpop.f32.mrf.mxu3 }
 0x205   : > { %v3554_v37 = vpack.c.bf16 %v2148_v57, %v2147_v38  ;;  %v1946_v32 = vadd.f32 %v1945_v42, %v4585_v34  ;;  %v1865_v34 = vpop.f32.mrf.mxu2 }
 0x207   : > { %3656 = vst [vmem:[%s4466_s26 + $0x50] sm:$0xff] %v3554_v37   ;;  %v2113_v53 = vadd.f32 %v2082_v26, %v1946_v32 }
 0x208   : > { %v2092_v10 = vpop.f32.mrf.mxu0 }
 0x209   : > { %v2133_v44 = vadd.f32 %v4626_v61, %v2113_v53 }
 0x20b   : > { %v2149_v48 = vmax.f32 %v2133_v44, 0.0 }
 0x20c   : > { %v1947_v54 = vpop.f32.mrf.mxu3 }
 0x20d   : > { %v1948_v7 = vadd.f32 %v1947_v54, %v4601_v17 }
 0x20f   : > { %v2114_v21 = vadd.f32 %v2084_v39, %v1948_v7  ;;  %v2317_v39 = vpop.f32.mrf.mxu1 }
 0x211   : > { %v2134_v30 = vadd.f32 %v4626_v61, %v2114_v21  ;;  %2568 = vmatmul.bf16.gmra.mxu3 %v4596_v15  ;;  %v1868_v15 = vpop.f32.mrf.mxu2 }
 0x213   : > { %v2150_v12 = vmax.f32 %v2134_v30, 0.0 }
 0x214   : > { %v1950_v11 = vpop.f32.mrf.mxu3 }
 0x215   : > { %v3559_v55 = vpack.c.bf16 %v2150_v12, %v2149_v48  ;;  %v1951_v46 = vadd.f32 %v1950_v11, %v1853_v49  ;;  %v2094_v49 = vpop.f32.mrf.mxu0 }
 0x217   : > { %3657 = vst [vmem:[%s4466_s26 + $0x58] sm:$0xff] %v3559_v55   ;;  %v2115_v18 = vadd.f32 %v2087_v6, %v1951_v46  ;;  %v2320_v32 = vpop.f32.mrf.mxu1  ;;  %v4678_v46 = vld [vmem:[%s4713_s6] ss:$0 sm:$0xff] }
 0x219   : > { %v2135_v13 = vadd.f32 %v4626_v61, %v2115_v18  ;;  %v1870_v51 = vpop.f32.mrf.mxu2 }
 0x21b   : > { %v2151_v45 = vmax.f32 %v2135_v13, 0.0 }
 0x21c   : > { %v1952_v33 = vpop.f32.mrf.mxu3 }
 0x21d   : > { %v1953_v17 = vadd.f32 %v1952_v33, %v1855_v2  ;;  %v2097_v41 = vpop.f32.mrf.mxu0 }
 0x21f   : > { %v2116_v43 = vadd.f32 %v2089_v52, %v1953_v17  ;;  %v2322_v52 = vpop.f32.mrf.mxu1 }
 0x221   : > { %v2136_v60 = vadd.f32 %v4626_v61, %v2116_v43  ;;  %2573 = vmatmul.bf16.gmra.mxu3 %v2473_v28  ;;  %v2412_v1 = vpop.f32.mrf.mxu2 }
 0x222   : > { %v2413_v55 = vadd.f32 %v2412_v1, %v2315_v20 }
 0x223   : > { %v2152_v24 = vmax.f32 %v2136_v60, 0.0 }
 0x224   : > { %v1955_v16 = vpop.f32.mrf.mxu3 }
 0x225   : > { %v3564_v25 = vpack.c.bf16 %v2152_v24, %v2151_v45  ;;  %v1956_v62 = vadd.f32 %v1955_v16, %v1858_v50  ;;  %v2099_v0 = vpop.f32.mrf.mxu0 }
 0x227   : > { %3658 = vst [vmem:[%s4466_s26 + $0x60] sm:$0xff] %v3564_v25   ;;  %v2117_v2 = vadd.f32 %v2092_v10, %v1956_v62  ;;  %v2325_v18 = vpop.f32.mrf.mxu1 }
 0x229   : > { %v2137_v3 = vadd.f32 %v4626_v61, %v2117_v2  ;;  %v2414_v9 = vpop.f32.mrf.mxu2 }
 0x22a   : > { %v2415_v10 = vadd.f32 %v2414_v9, %v2317_v39 }
 0x22b   : > { %v2153_v26 = vmax.f32 %v2137_v3, 0.0 }
 0x22c   : > { %v1957_v8 = vpop.f32.mrf.mxu3 }
 0x22d   : > { %v1958_v19 = vadd.f32 %v1957_v8, %v1860_v63  ;;  %v2102_v57 = vpop.f32.mrf.mxu0 }
 0x22f   : > { %v2118_v40 = vadd.f32 %v2094_v49, %v1958_v19  ;;  %v2327_v45 = vpop.f32.mrf.mxu1 }
 0x231   : > { %v2138_v59 = vadd.f32 %v4626_v61, %v2118_v40  ;;  %2578 = vmatmul.bf16.gmra.mxu3 %v2474_v36  ;;  %v2417_v53 = vpop.f32.mrf.mxu2 }
 0x232   : > { %v2418_v25 = vadd.f32 %v2417_v53, %v2320_v32 }
 0x233   : > { %v2154_v35 = vmax.f32 %v2138_v59, 0.0 }
 0x234   : > { %v1960_v27 = vpop.f32.mrf.mxu3 }
 0x235   : > { %v3569_v50 = vpack.c.bf16 %v2154_v35, %v2153_v26  ;;  %v1961_v58 = vadd.f32 %v1960_v27, %v1863_v23  ;;  %v2104_v44 = vpop.f32.mrf.mxu0 }
 0x237   : > { %3659 = vst [vmem:[%s4466_s26 + $0x68] sm:$0xff] %v3569_v50   ;;  %v2119_v29 = vadd.f32 %v2097_v41, %v1961_v58  ;;  %v2330_v19 = vpop.f32.mrf.mxu1 }
 0x239   : > { %v2139_v63 = vadd.f32 %v4626_v61, %v2119_v29  ;;  %v2419_v56 = vpop.f32.mrf.mxu2 }
 0x23a   : > { %v2420_v62 = vadd.f32 %v2419_v56, %v2322_v52 }
 0x23b   : > { %v2155_v5 = vmax.f32 %v2139_v63, 0.0 }
 0x23c   : > { %v1962_v31 = vpop.f32.mrf.mxu3 }
 0x23d   : > { %v1963_v4 = vadd.f32 %v1962_v31, %v1865_v34 }
 0x23f   : > { %v2120_v38 = vadd.f32 %v2099_v0, %v1963_v4  ;;  %v2332_v1 = vpop.f32.mrf.mxu1 }
 0x241   : > { %v2140_v22 = vadd.f32 %v4626_v61, %v2120_v38  ;;  %2583 = vmatmul.bf16.gmra.mxu3 %v2475_v14  ;;  %v2422_v33 = vpop.f32.mrf.mxu2 }
 0x242   : > { %v2423_v35 = vadd.f32 %v2422_v33, %v2325_v18 }
 0x243   : > { %v2156_v36 = vmax.f32 %v2140_v22, 0.0 }
 0x244   : > { %v1965_v42 = vpop.f32.mrf.mxu3 }
 0x245   : > { %v3574_v37 = vpack.c.bf16 %v2156_v36, %v2155_v5  ;;  %v1966_v6 = vadd.f32 %v1965_v42, %v1868_v15 }
 0x247   : > { %3660 = vst [vmem:[%s4466_s26 + $0x70] sm:$0xff] %v3574_v37   ;;  %v2121_v23 = vadd.f32 %v2102_v57, %v1966_v6  ;;  %v2335_v63 = vpop.f32.mrf.mxu1 }
 0x249   : > { %v2141_v21 = vadd.f32 %v4626_v61, %v2121_v23  ;;  %v2424_v16 = vpop.f32.mrf.mxu2 }
 0x24a   : > { %v2425_v58 = vadd.f32 %v2424_v16, %v2327_v45 }
 0x24b   : > { %v2157_v14 = vmax.f32 %v2141_v21, 0.0 }
 0x24c   : > { %v1967_v54 = vpop.f32.mrf.mxu3 }
 0x24d   : > { %v1968_v7 = vadd.f32 %v1967_v54, %v1870_v51 }
 0x24f   : > { %v2122_v30 = vadd.f32 %v2104_v44, %v1968_v7  ;;  %v2337_v37 = vpop.f32.mrf.mxu1 }
 0x251   : > { %v2142_v47 = vadd.f32 %v4626_v61, %v2122_v30  ;;  %v2427_v40 = vpop.f32.mrf.mxu2 }
 0x252   : > { %v2428_v36 = vadd.f32 %v2427_v40, %v2330_v19 }
 0x253   : > { %v2158_v48 = vmax.f32 %v2142_v47, 0.0 }
 0x254   : > { %v2549_v12 = vpop.f32.mrf.mxu3 }
 0x255   : > { %v3579_v11 = vpack.c.bf16 %v2158_v48, %v2157_v14  ;;  %v2589_v34 = vadd.f32 %v2549_v12, %v2413_v55 }
 0x257   : > { %3661 = vst [vmem:[%s4466_s26 + $0x78] sm:$0xff] %v3579_v11   ;;  %v2609_v61 = vadd.f32 %v4678_v46, %v2589_v34  ;;  %v2340_v52 = vpop.f32.mrf.mxu1 }
 0x259   : > { %v2625_v28 = vmax.f32 %v2609_v61, 0.0  ;;  %v2429_v50 = vpop.f32.mrf.mxu2 }
 0x25a   : > { %v2430_v42 = vadd.f32 %v2429_v50, %v2332_v1 }
 0x25c   : > { %v2551_v17 = vpop.f32.mrf.mxu3 }
 0x25d   : > { %v2590_v13 = vadd.f32 %v2551_v17, %v2415_v10 }
 0x25f   : > { %v2610_v43 = vadd.f32 %v4678_v46, %v2590_v13  ;;  %v2342_v18 = vpop.f32.mrf.mxu1 }
 0x261   : > { %v2626_v15 = vmax.f32 %v2610_v43, 0.0  ;;  %v2432_v22 = vpop.f32.mrf.mxu2 }
 0x262   : > { %v2433_v47 = vadd.f32 %v2432_v22, %v2335_v63 }
 0x263   : > { %v3584_v60 = vpack.c.bf16 %v2626_v15, %v2625_v28 }
 0x264   : > { %v2554_v24 = vpop.f32.mrf.mxu3 }
 0x265   : > { %3662 = vst [vmem:[%s4466_s26 + $0x80] sm:$0xff] %v3584_v60   ;;  %v2591_v49 = vadd.f32 %v2554_v24, %v2418_v25 }
 0x267   : > { %v2611_v2 = vadd.f32 %v4678_v46, %v2591_v49  ;;  %v2345_v15 = vpop.f32.mrf.mxu1 }
 0x269   : > { %v2627_v41 = vmax.f32 %v2611_v2, 0.0  ;;  %v2434_v23 = vpop.f32.mrf.mxu2 }
 0x26a   : > { %v2435_v48 = vadd.f32 %v2434_v23, %v2337_v37 }
 0x26c   : > { %v2556_v51 = vpop.f32.mrf.mxu3 }
 0x26d   : > { %v2592_v8 = vadd.f32 %v2556_v51, %v2420_v62 }
 0x26f   : > { %v2612_v3 = vadd.f32 %v4678_v46, %v2592_v8  ;;  %v2347_v8 = vpop.f32.mrf.mxu1 }
 0x271   : > { %v2628_v59 = vmax.f32 %v2612_v3, 0.0  ;;  %v2437_v56 = vpop.f32.mrf.mxu2 }
 0x272   : > { %v2438_v43 = vadd.f32 %v2437_v56, %v2340_v52 }
 0x273   : > { %v3589_v20 = vpack.c.bf16 %v2628_v59, %v2627_v41 }
 0x274   : > { %v2559_v26 = vpop.f32.mrf.mxu3 }
 0x275   : > { %3663 = vst [vmem:[%s4466_s26 + $0x88] sm:$0xff] %v3589_v20   ;;  %v2593_v27 = vadd.f32 %v2559_v26, %v2423_v35 }
 0x277   : > { %v2613_v29 = vadd.f32 %v4678_v46, %v2593_v27  ;;  %v2350_v1 = vpop.f32.mrf.mxu1 }
 0x279   : > { %v2629_v4 = vmax.f32 %v2613_v29, 0.0  ;;  %v2439_v17 = vpop.f32.mrf.mxu2 }
 0x27a   : > { %v2440_v60 = vadd.f32 %v2439_v17, %v2342_v18 }
 0x27c   : > { %v2561_v0 = vpop.f32.mrf.mxu3 }
 0x27d   : > { %v2594_v39 = vadd.f32 %v2561_v0, %v2425_v58 }
 0x27f   : > { %v2614_v31 = vadd.f32 %v4678_v46, %v2594_v39 }
 0x281   : > { %v2630_v9 = vmax.f32 %v2614_v31, 0.0  ;;  %v2442_v45 = vpop.f32.mrf.mxu2 }
 0x282   : > { %v2443_v40 = vadd.f32 %v2442_v45, %v2345_v15 }
 0x283   : > { %v3594_v38 = vpack.c.bf16 %v2630_v9, %v2629_v4  ;;  %v2352_v4 = vpop.f32.mrf.mxu1 }
 0x284   : > { %v2564_v5 = vpop.f32.mrf.mxu3 }
 0x285   : > { %3664 = vst [vmem:[%s4466_s26 + $0x90] sm:$0xff] %v3594_v38   ;;  %v2595_v57 = vadd.f32 %v2564_v5, %v2428_v36 }
 0x287   : > { %v2615_v6 = vadd.f32 %v4678_v46, %v2595_v57 }
 0x289   : > { %v2631_v7 = vmax.f32 %v2615_v6, 0.0  ;;  %v2444_v3 = vpop.f32.mrf.mxu2 }
 0x28a   : > { %v2445_v59 = vadd.f32 %v2444_v3, %v2347_v8 }
 0x28c   : > { %v2566_v32 = vpop.f32.mrf.mxu3 }
 0x28d   : > { %v2596_v53 = vadd.f32 %v2566_v32, %v2430_v42 }
 0x28f   : > { %v2616_v54 = vadd.f32 %v4678_v46, %v2596_v53 }
 0x291   : > { %v2632_v44 = vmax.f32 %v2616_v54, 0.0  ;;  %v2447_v50 = vpop.f32.mrf.mxu2 }
 0x292   : > { %v2448_v31 = vadd.f32 %v2447_v50, %v2350_v1 }
 0x293   : > { %v3599_v21 = vpack.c.bf16 %v2632_v44, %v2631_v7 }
 0x294   : > { %v2569_v30 = vpop.f32.mrf.mxu3 }
 0x295   : > { %3665 = vst [vmem:[%s4466_s26 + $0x98] sm:$0xff] %v3599_v21   ;;  %v2597_v14 = vadd.f32 %v2569_v30, %v2433_v47 }
 0x297   : > { %v2617_v11 = vadd.f32 %v4678_v46, %v2597_v14 }
 0x299   : > { %v2633_v10 = vmax.f32 %v2617_v11, 0.0  ;;  %v2449_v63 = vpop.f32.mrf.mxu2 }
 0x29a   : > { %v2450_v38 = vadd.f32 %v2449_v63, %v2352_v4 }
 0x29c   : > { %v2571_v12 = vpop.f32.mrf.mxu3 }
 0x29d   : > { %v2598_v55 = vadd.f32 %v2571_v12, %v2435_v48 }
 0x29f   : > { %v2618_v34 = vadd.f32 %v4678_v46, %v2598_v55 }
 0x2a1   : > { %v2634_v33 = vmax.f32 %v2618_v34, 0.0 }
 0x2a3   : > { %v3604_v61 = vpack.c.bf16 %v2634_v33, %v2633_v10 }
 0x2a4   : > { %v2574_v13 = vpop.f32.mrf.mxu3 }
 0x2a5   : > { %3666 = vst [vmem:[%s4466_s26 + $0xa0] sm:$0xff] %v3604_v61   ;;  %v2599_v28 = vadd.f32 %v2574_v13, %v2438_v43 }
 0x2a7   : > { %v2619_v16 = vadd.f32 %v4678_v46, %v2599_v28 }
 0x2a9   : > { %v2635_v62 = vmax.f32 %v2619_v16, 0.0 }
 0x2ac   : > { %v2576_v24 = vpop.f32.mrf.mxu3 }
 0x2ad   : > { %v2600_v25 = vadd.f32 %v2576_v24, %v2440_v60 }
 0x2af   : > { %v2620_v49 = vadd.f32 %v4678_v46, %v2600_v25 }
 0x2b1   : > { %v2636_v51 = vmax.f32 %v2620_v49, 0.0 }
 0x2b3   : > { %v3609_v2 = vpack.c.bf16 %v2636_v51, %v2635_v62 }
 0x2b4   : > { %v2579_v19 = vpop.f32.mrf.mxu3 }
 0x2b5   : > { %3667 = vst [vmem:[%s4466_s26 + $0xa8] sm:$0xff] %v3609_v2   ;;  %v2601_v41 = vadd.f32 %v2579_v19, %v2443_v40 }
 0x2b7   : > { %v2621_v26 = vadd.f32 %v4678_v46, %v2601_v41 }
 0x2b9   : > { %v2637_v58 = vmax.f32 %v2621_v26, 0.0 }
 0x2bc   : > { %v2581_v20 = vpop.f32.mrf.mxu3 }
 0x2bd   : > { %v2602_v35 = vadd.f32 %v2581_v20, %v2445_v59 }
 0x2bf   : > { %v2622_v27 = vadd.f32 %v4678_v46, %v2602_v35 }
 0x2c1   : > { %v2638_v0 = vmax.f32 %v2622_v27, 0.0 }
 0x2c3   : > { %v3614_v29 = vpack.c.bf16 %v2638_v0, %v2637_v58 }
 0x2c4   : > { %v2584_v39 = vpop.f32.mrf.mxu3 }
 0x2c5   : > { %3668 = vst [vmem:[%s4466_s26 + $0xb0] sm:$0xff] %v3614_v29   ;;  %v2603_v9 = vadd.f32 %v2584_v39, %v2448_v31 }
 0x2c7   : > { %v2623_v5 = vadd.f32 %v4678_v46, %v2603_v9 }
 0x2c9   : > { %v2639_v42 = vmax.f32 %v2623_v5, 0.0 }
 0x2cc   : > { %v2586_v22 = vpop.f32.mrf.mxu3 }
 0x2cd   : > { %v2604_v36 = vadd.f32 %v2586_v22, %v2450_v38 }
 0x2cf   : > { %v2624_v57 = vadd.f32 %v4678_v46, %v2604_v36 }
 0x2d1   : > { %v2640_v37 = vmax.f32 %v2624_v57, 0.0 }
 0x2d3   : > { %v3619_v32 = vpack.c.bf16 %v2640_v37, %v2639_v42 }
 0x2d5   : > { %3669 = vst [vmem:[%s4466_s26 + $0xb8] sm:$0xff] %v3619_v32  }
 0x2d6 PF: > { %s17_s24 = sadd.s32 1, %s3703_s24  }
 0x2d7   : > { %p14_p5 = scmp.ge.s32.totalorder %s17_s24, 4  }
 0x2d9   :  { %16 = sbr.rel (!%p14_p5) target bundleno = 1 (0x1), region = 78 }

</bundles_post_ra>
